<compile_context>
chip_gen: v7x
topology: tpu7x:2x2x1
jax: 0.10.0
libtpu: 0.0.40
codegen_flags: <defaults>
</compile_context>

<pallas_src>
import jax
import jax.numpy as jnp
from jax.experimental import pallas as pl
from jax.experimental.pallas import tpu as pltpu


# ----------------------------------------------------------------------------
# Glue: build the (K, K) motion kernel (kornia.get_motion_kernel2d, 'nearest')
# ----------------------------------------------------------------------------
def get_motion_kernel2d(kernel_size: int, angle_deg: float, direction: float):
    assert kernel_size % 2 == 1 and kernel_size >= 3, "kernel_size must be odd >= 3"
    K = kernel_size
    f32 = jnp.float32

    # direction from [-1, 1] to [0, 1]
    d = (jnp.clip(jnp.asarray(direction, f32), -1.0, 1.0) + 1.0) / 2.0
    idx = jnp.arange(K, dtype=f32)
    row = d + ((1.0 - 2.0 * d) / (K - 1)) * idx            # linspace(d, 1-d, K)
    kern = jnp.zeros((K, K), f32).at[K // 2, :].set(row)   # mass on center row

    # Rotate anti-clockwise by `angle_deg` about the center (K-1)/2,
    # nearest-neighbor, zeros outside.  For a pure rotation about the exact
    # center with same-size output, kornia's normalize/denormalize pipeline
    # reduces exactly to this pixel-space inverse map regardless of
    # align_corners, so the dst->src map below matches kornia.rotate.
    theta = jnp.deg2rad(jnp.asarray(angle_deg, f32))
    c = (K - 1) / 2.0
    ys, xs = jnp.meshgrid(idx, idx, indexing="ij")          # destination coords
    cos_t, sin_t = jnp.cos(theta), jnp.sin(theta)
    x_s = cos_t * (xs - c) - sin_t * (ys - c) + c
    y_s = sin_t * (xs - c) + cos_t * (ys - c) + c
    xi = jnp.round(x_s).astype(jnp.int32)
    yi = jnp.round(y_s).astype(jnp.int32)
    valid = (xi >= 0) & (xi < K) & (yi >= 0) & (yi < K)
    xi_c = jnp.clip(xi, 0, K - 1)
    yi_c = jnp.clip(yi, 0, K - 1)
    rot = jnp.where(valid, kern[yi_c, xi_c], 0.0)

    # kornia normalizes with a plain divide (no zero guard); we match it.
    return rot / jnp.sum(rot)


# ----------------------------------------------------------------------------
# Pallas kernel: depthwise 2D cross-correlation of TB padded planes
# ----------------------------------------------------------------------------
def _make_conv_kernel(H: int, K: int, TB: int, Wpad: int):
    def conv_kernel(w_ref, xp_ref, o_ref):
        # w_ref : (K, K) f32 weights in SMEM
        # xp_ref: (TB, H+K-1, Wpad) padded planes in VMEM (lane-dense)
        # o_ref : (TB, H, Wpad) output block (lane-dense, unmasked stores)
        x = xp_ref[...].astype(jnp.float32)   # single upcast (v5e: no bf16 VPU)

        # Hoist all K*K SMEM scalar reads out of the unrolled tap loop.
        w = [[w_ref[a, b] for b in range(K)] for a in range(K)]

        acc = jnp.zeros((TB, H, Wpad), jnp.float32)
        for b in range(K):
            # One XLU lane roll per column offset (K total, not K^2 shifts);
            # roll(x, Wpad-b)[..., j] == x[..., (j+b) % Wpad], and for the
            # valid output columns j < W we have j+b < Wpad (no wrap-around).
            xb = x if b == 0 else pltpu.roll(x, shift=Wpad - b, axis=2)
            for a in range(K):                 # cheap sublane-offset slices
                acc = acc + w[a][b] * xb[:, a:a + H, :]

        o_ref[...] = acc.astype(o_ref.dtype)

    return conv_kernel


# ----------------------------------------------------------------------------
# Wrapper == MotionBlur.forward
# ----------------------------------------------------------------------------
def motion_blur(x, kernel_size: int, angle: float, direction: float,
                border_type: str = "constant", mode: str = "nearest"):
    assert border_type in ("constant", "reflect", "replicate", "circular")
    assert mode == "nearest"  # TODO(synk): bilinear kernel-rotation mode not implemented
    B, C, H, W = x.shape
    K = kernel_size
    p = K // 2
    Hp, Wp = H + 2 * p, W + 2 * p
    BC = B * C

    w = get_motion_kernel2d(K, angle, direction)            # (K, K) float32

    # Lane-dense padded width: multiple of 128, >= W + K - 1.
    Wpad = pl.cdiv(max(Wp, 128), 128) * 128

    # Planes per grid step: large DMAs, bounded f32 accumulator, and (v7x)
    # keep at least 2 grid steps so the parallel axis splits across both TCs.
    itemsize = jnp.dtype(x.dtype).itemsize
    tb = max(1, (2 << 20) // (Hp * Wpad * itemsize))        # ~2 MiB input block
    tb = min(tb, max(1, (512 << 10) // (H * Wpad * 4)))     # bound accumulator
    if BC >= 2:
        tb = min(tb, max(1, BC // 2))                       # >= 2 grid steps
    tb = max(1, min(tb, BC))
    BCpad = pl.cdiv(BC, tb) * tb

    # Halo pad per border_type, plus zero pad of extra lanes / extra planes.
    # For the default 'constant' mode this is a single pad pass.
    # TODO(synk): fuse halo handling into the kernel (zeroed VMEM slab + edge
    # masking) to remove the extra HBM round trip for the non-constant modes.
    x3 = x.reshape(BC, H, W)
    if border_type == "constant":
        xp = jnp.pad(x3, ((0, BCpad - BC), (p, p), (p, Wpad - W - p)))
    else:
        pad_mode = {"reflect": "reflect", "replicate": "edge",
                    "circular": "wrap"}[border_type]
        xp = jnp.pad(x3, ((0, 0), (p, p), (p, p)), mode=pad_mode)
        xp = jnp.pad(xp, ((0, BCpad - BC), (0, 0), (0, Wpad - Wp)))

    out = pl.pallas_call(
        _make_conv_kernel(H, K, tb, Wpad),
        out_shape=jax.ShapeDtypeStruct((BCpad, H, Wpad), x.dtype),
        grid=(BCpad // tb,),
        in_specs=[
            pl.BlockSpec(memory_space=pltpu.MemorySpace.SMEM),   # (K,K) weights
            pl.BlockSpec((tb, Hp, Wpad), lambda i: (i, 0, 0)),   # TB padded planes
        ],
        out_specs=pl.BlockSpec((tb, H, Wpad), lambda i: (i, 0, 0)),
        compiler_params=pltpu.CompilerParams(
            dimension_semantics=("parallel",)),
    )(w, xp)

    return out[:BC, :, :W].reshape(B, C, H, W)


class MotionBlur:
    """JAX/Pallas port of kornia.filters.MotionBlur (no learned parameters)."""

    def __init__(self, kernel_size: int, angle: float, direction: float,
                 border_type: str = "constant"):
        self.kernel_size = kernel_size
        self.angle = angle
        self.direction = direction
        self.border_type = border_type

    def __call__(self, x):
        return motion_blur(x, self.kernel_size, self.angle, self.direction,
                           self.border_type)


# ----------------------------------------------------------------------------
# Pure-JAX reference (padded shifted-slice cross-correlation)
# ----------------------------------------------------------------------------
def _ref_motion_blur(x, K, angle, direction, border_type):
    B, C, H, W = x.shape
    p = K // 2
    w = get_motion_kernel2d(K, angle, direction)
    pad_mode = {"constant": "constant", "reflect": "reflect",
                "replicate": "edge", "circular": "wrap"}[border_type]
    xp = jnp.pad(x, ((0, 0), (0, 0), (p, p), (p, p)), mode=pad_mode)
    acc = jnp.zeros((B, C, H, W), jnp.float32)
    for a in range(K):
        for b in range(K):
            acc = acc + w[a, b] * xp[:, :, a:a + H, b:b + W]
    return acc.astype(x.dtype)


# ----------------------------------------------------------------------------
if __name__ == "__main__":
    key = jax.random.PRNGKey(0)
    B, C, H, W = 2, 4, 16, 16
    x = jax.random.normal(key, (B, C, H, W), dtype=jnp.float32)

    mb = MotionBlur(kernel_size=5, angle=35.0, direction=0.5,
                    border_type="constant")
    out = jax.block_until_ready(mb(x))
    assert out.shape == (B, C, H, W) and out.dtype == x.dtype
    ref = _ref_motion_blur(x, 5, 35.0, 0.5, "constant")
    assert jnp.allclose(out, ref, atol=1e-5, rtol=1e-5)

    # Exercise a non-default border mode, odd plane count and non-square HxW.
    x2 = jax.random.normal(jax.random.PRNGKey(0), (1, 3, 10, 20),
                           dtype=jnp.float32)
    mb2 = MotionBlur(kernel_size=3, angle=90.0, direction=1.0,
                     border_type="reflect")
    out2 = jax.block_until_ready(mb2(x2))
    ref2 = _ref_motion_blur(x2, 3, 90.0, 1.0, "reflect")
    assert out2.shape == x2.shape
    assert jnp.allclose(out2, ref2, atol=1e-5, rtol=1e-5)

    print("KERNEL_OK")
</pallas_src>

<mosaic_0001>
module attributes {stable_mosaic.version = 11 : i64} {
  func.func @conv_kernel(%arg0: i32, %arg1: memref<5x5xf32, #tpu.memory_space<smem>>, %arg2: memref<4x20x128xf32, #tpu.memory_space<vmem>>, %arg3: memref<4x16x128xf32, #tpu.memory_space<vmem>>) attributes {dimension_semantics = [#tpu.dimension_semantics<parallel>], iteration_bounds = array<i64: 2>, scalar_prefetch = 0 : i64, scratch_operands = 0 : i64, tpu.core_type = #tpu.core_type<tc>, window_params = [{transform_indices = @transform_0, window_bounds = array<i64: 5, 5>}, {transform_indices = @transform_1, window_bounds = array<i64: 4, 20, 128>}, {transform_indices = @transform_2, window_bounds = array<i64: 4, 16, 128>}]} {
    %c0 = arith.constant 0 : index
    %c0_0 = arith.constant 0 : index
    %c0_1 = arith.constant 0 : index
    %0 = vector.load %arg2[%c0, %c0_0, %c0_1] : memref<4x20x128xf32, #tpu.memory_space<vmem>>, vector<4x20x128xf32>
    %c0_2 = arith.constant 0 : index
    %c0_3 = arith.constant 0 : index
    %1 = memref.load %arg1[%c0_2, %c0_3] : memref<5x5xf32, #tpu.memory_space<smem>>
    %c0_4 = arith.constant 0 : index
    %c1 = arith.constant 1 : index
    %2 = memref.load %arg1[%c0_4, %c1] : memref<5x5xf32, #tpu.memory_space<smem>>
    %c0_5 = arith.constant 0 : index
    %c2 = arith.constant 2 : index
    %3 = memref.load %arg1[%c0_5, %c2] : memref<5x5xf32, #tpu.memory_space<smem>>
    %c0_6 = arith.constant 0 : index
    %c3 = arith.constant 3 : index
    %4 = memref.load %arg1[%c0_6, %c3] : memref<5x5xf32, #tpu.memory_space<smem>>
    %c0_7 = arith.constant 0 : index
    %c4 = arith.constant 4 : index
    %5 = memref.load %arg1[%c0_7, %c4] : memref<5x5xf32, #tpu.memory_space<smem>>
    %c1_8 = arith.constant 1 : index
    %c0_9 = arith.constant 0 : index
    %6 = memref.load %arg1[%c1_8, %c0_9] : memref<5x5xf32, #tpu.memory_space<smem>>
    %c1_10 = arith.constant 1 : index
    %c1_11 = arith.constant 1 : index
    %7 = memref.load %arg1[%c1_10, %c1_11] : memref<5x5xf32, #tpu.memory_space<smem>>
    %c1_12 = arith.constant 1 : index
    %c2_13 = arith.constant 2 : index
    %8 = memref.load %arg1[%c1_12, %c2_13] : memref<5x5xf32, #tpu.memory_space<smem>>
    %c1_14 = arith.constant 1 : index
    %c3_15 = arith.constant 3 : index
    %9 = memref.load %arg1[%c1_14, %c3_15] : memref<5x5xf32, #tpu.memory_space<smem>>
    %c1_16 = arith.constant 1 : index
    %c4_17 = arith.constant 4 : index
    %10 = memref.load %arg1[%c1_16, %c4_17] : memref<5x5xf32, #tpu.memory_space<smem>>
    %c2_18 = arith.constant 2 : index
    %c0_19 = arith.constant 0 : index
    %11 = memref.load %arg1[%c2_18, %c0_19] : memref<5x5xf32, #tpu.memory_space<smem>>
    %c2_20 = arith.constant 2 : index
    %c1_21 = arith.constant 1 : index
    %12 = memref.load %arg1[%c2_20, %c1_21] : memref<5x5xf32, #tpu.memory_space<smem>>
    %c2_22 = arith.constant 2 : index
    %c2_23 = arith.constant 2 : index
    %13 = memref.load %arg1[%c2_22, %c2_23] : memref<5x5xf32, #tpu.memory_space<smem>>
    %c2_24 = arith.constant 2 : index
    %c3_25 = arith.constant 3 : index
    %14 = memref.load %arg1[%c2_24, %c3_25] : memref<5x5xf32, #tpu.memory_space<smem>>
    %c2_26 = arith.constant 2 : index
    %c4_27 = arith.constant 4 : index
    %15 = memref.load %arg1[%c2_26, %c4_27] : memref<5x5xf32, #tpu.memory_space<smem>>
    %c3_28 = arith.constant 3 : index
    %c0_29 = arith.constant 0 : index
    %16 = memref.load %arg1[%c3_28, %c0_29] : memref<5x5xf32, #tpu.memory_space<smem>>
    %c3_30 = arith.constant 3 : index
    %c1_31 = arith.constant 1 : index
    %17 = memref.load %arg1[%c3_30, %c1_31] : memref<5x5xf32, #tpu.memory_space<smem>>
    %c3_32 = arith.constant 3 : index
    %c2_33 = arith.constant 2 : index
    %18 = memref.load %arg1[%c3_32, %c2_33] : memref<5x5xf32, #tpu.memory_space<smem>>
    %c3_34 = arith.constant 3 : index
    %c3_35 = arith.constant 3 : index
    %19 = memref.load %arg1[%c3_34, %c3_35] : memref<5x5xf32, #tpu.memory_space<smem>>
    %c3_36 = arith.constant 3 : index
    %c4_37 = arith.constant 4 : index
    %20 = memref.load %arg1[%c3_36, %c4_37] : memref<5x5xf32, #tpu.memory_space<smem>>
    %c4_38 = arith.constant 4 : index
    %c0_39 = arith.constant 0 : index
    %21 = memref.load %arg1[%c4_38, %c0_39] : memref<5x5xf32, #tpu.memory_space<smem>>
    %c4_40 = arith.constant 4 : index
    %c1_41 = arith.constant 1 : index
    %22 = memref.load %arg1[%c4_40, %c1_41] : memref<5x5xf32, #tpu.memory_space<smem>>
    %c4_42 = arith.constant 4 : index
    %c2_43 = arith.constant 2 : index
    %23 = memref.load %arg1[%c4_42, %c2_43] : memref<5x5xf32, #tpu.memory_space<smem>>
    %c4_44 = arith.constant 4 : index
    %c3_45 = arith.constant 3 : index
    %24 = memref.load %arg1[%c4_44, %c3_45] : memref<5x5xf32, #tpu.memory_space<smem>>
    %c4_46 = arith.constant 4 : index
    %c4_47 = arith.constant 4 : index
    %25 = memref.load %arg1[%c4_46, %c4_47] : memref<5x5xf32, #tpu.memory_space<smem>>
    %cst = arith.constant 0.000000e+00 : f32
    %26 = vector.broadcast %cst : f32 to vector<4x16x128xf32>
    %27 = vector.extract_strided_slice %0 {offsets = [0, 0, 0], sizes = [4, 16, 128], strides = [1, 1, 1]} : vector<4x20x128xf32> to vector<4x16x128xf32>
    %28 = vector.broadcast %1 : f32 to vector<4x16x128xf32>
    %29 = arith.mulf %28, %27 : vector<4x16x128xf32>
    %30 = arith.addf %26, %29 : vector<4x16x128xf32>
    %31 = vector.extract_strided_slice %0 {offsets = [0, 1, 0], sizes = [4, 16, 128], strides = [1, 1, 1]} : vector<4x20x128xf32> to vector<4x16x128xf32>
    %32 = vector.broadcast %6 : f32 to vector<4x16x128xf32>
    %33 = arith.mulf %32, %31 : vector<4x16x128xf32>
    %34 = arith.addf %30, %33 : vector<4x16x128xf32>
    %35 = vector.extract_strided_slice %0 {offsets = [0, 2, 0], sizes = [4, 16, 128], strides = [1, 1, 1]} : vector<4x20x128xf32> to vector<4x16x128xf32>
    %36 = vector.broadcast %11 : f32 to vector<4x16x128xf32>
    %37 = arith.mulf %36, %35 : vector<4x16x128xf32>
    %38 = arith.addf %34, %37 : vector<4x16x128xf32>
    %39 = vector.extract_strided_slice %0 {offsets = [0, 3, 0], sizes = [4, 16, 128], strides = [1, 1, 1]} : vector<4x20x128xf32> to vector<4x16x128xf32>
    %40 = vector.broadcast %16 : f32 to vector<4x16x128xf32>
    %41 = arith.mulf %40, %39 : vector<4x16x128xf32>
    %42 = arith.addf %38, %41 : vector<4x16x128xf32>
    %43 = vector.extract_strided_slice %0 {offsets = [0, 4, 0], sizes = [4, 16, 128], strides = [1, 1, 1]} : vector<4x20x128xf32> to vector<4x16x128xf32>
    %44 = vector.broadcast %21 : f32 to vector<4x16x128xf32>
    %45 = arith.mulf %44, %43 : vector<4x16x128xf32>
    %46 = arith.addf %42, %45 : vector<4x16x128xf32>
    %c127_i32 = arith.constant 127 : i32
    %47 = tpu.dynamic_rotate %0 by %c127_i32 dim 2 : vector<4x20x128xf32>, i32 -> vector<4x20x128xf32>
    %48 = vector.extract_strided_slice %47 {offsets = [0, 0, 0], sizes = [4, 16, 128], strides = [1, 1, 1]} : vector<4x20x128xf32> to vector<4x16x128xf32>
    %49 = vector.broadcast %2 : f32 to vector<4x16x128xf32>
    %50 = arith.mulf %49, %48 : vector<4x16x128xf32>
    %51 = arith.addf %46, %50 : vector<4x16x128xf32>
    %52 = vector.extract_strided_slice %47 {offsets = [0, 1, 0], sizes = [4, 16, 128], strides = [1, 1, 1]} : vector<4x20x128xf32> to vector<4x16x128xf32>
    %53 = vector.broadcast %7 : f32 to vector<4x16x128xf32>
    %54 = arith.mulf %53, %52 : vector<4x16x128xf32>
    %55 = arith.addf %51, %54 : vector<4x16x128xf32>
    %56 = vector.extract_strided_slice %47 {offsets = [0, 2, 0], sizes = [4, 16, 128], strides = [1, 1, 1]} : vector<4x20x128xf32> to vector<4x16x128xf32>
    %57 = vector.broadcast %12 : f32 to vector<4x16x128xf32>
    %58 = arith.mulf %57, %56 : vector<4x16x128xf32>
    %59 = arith.addf %55, %58 : vector<4x16x128xf32>
    %60 = vector.extract_strided_slice %47 {offsets = [0, 3, 0], sizes = [4, 16, 128], strides = [1, 1, 1]} : vector<4x20x128xf32> to vector<4x16x128xf32>
    %61 = vector.broadcast %17 : f32 to vector<4x16x128xf32>
    %62 = arith.mulf %61, %60 : vector<4x16x128xf32>
    %63 = arith.addf %59, %62 : vector<4x16x128xf32>
    %64 = vector.extract_strided_slice %47 {offsets = [0, 4, 0], sizes = [4, 16, 128], strides = [1, 1, 1]} : vector<4x20x128xf32> to vector<4x16x128xf32>
    %65 = vector.broadcast %22 : f32 to vector<4x16x128xf32>
    %66 = arith.mulf %65, %64 : vector<4x16x128xf32>
    %67 = arith.addf %63, %66 : vector<4x16x128xf32>
    %c126_i32 = arith.constant 126 : i32
    %68 = tpu.dynamic_rotate %0 by %c126_i32 dim 2 : vector<4x20x128xf32>, i32 -> vector<4x20x128xf32>
    %69 = vector.extract_strided_slice %68 {offsets = [0, 0, 0], sizes = [4, 16, 128], strides = [1, 1, 1]} : vector<4x20x128xf32> to vector<4x16x128xf32>
    %70 = vector.broadcast %3 : f32 to vector<4x16x128xf32>
    %71 = arith.mulf %70, %69 : vector<4x16x128xf32>
    %72 = arith.addf %67, %71 : vector<4x16x128xf32>
    %73 = vector.extract_strided_slice %68 {offsets = [0, 1, 0], sizes = [4, 16, 128], strides = [1, 1, 1]} : vector<4x20x128xf32> to vector<4x16x128xf32>
    %74 = vector.broadcast %8 : f32 to vector<4x16x128xf32>
    %75 = arith.mulf %74, %73 : vector<4x16x128xf32>
    %76 = arith.addf %72, %75 : vector<4x16x128xf32>
    %77 = vector.extract_strided_slice %68 {offsets = [0, 2, 0], sizes = [4, 16, 128], strides = [1, 1, 1]} : vector<4x20x128xf32> to vector<4x16x128xf32>
    %78 = vector.broadcast %13 : f32 to vector<4x16x128xf32>
    %79 = arith.mulf %78, %77 : vector<4x16x128xf32>
    %80 = arith.addf %76, %79 : vector<4x16x128xf32>
    %81 = vector.extract_strided_slice %68 {offsets = [0, 3, 0], sizes = [4, 16, 128], strides = [1, 1, 1]} : vector<4x20x128xf32> to vector<4x16x128xf32>
    %82 = vector.broadcast %18 : f32 to vector<4x16x128xf32>
    %83 = arith.mulf %82, %81 : vector<4x16x128xf32>
    %84 = arith.addf %80, %83 : vector<4x16x128xf32>
    %85 = vector.extract_strided_slice %68 {offsets = [0, 4, 0], sizes = [4, 16, 128], strides = [1, 1, 1]} : vector<4x20x128xf32> to vector<4x16x128xf32>
    %86 = vector.broadcast %23 : f32 to vector<4x16x128xf32>
    %87 = arith.mulf %86, %85 : vector<4x16x128xf32>
    %88 = arith.addf %84, %87 : vector<4x16x128xf32>
    %c125_i32 = arith.constant 125 : i32
    %89 = tpu.dynamic_rotate %0 by %c125_i32 dim 2 : vector<4x20x128xf32>, i32 -> vector<4x20x128xf32>
    %90 = vector.extract_strided_slice %89 {offsets = [0, 0, 0], sizes = [4, 16, 128], strides = [1, 1, 1]} : vector<4x20x128xf32> to vector<4x16x128xf32>
    %91 = vector.broadcast %4 : f32 to vector<4x16x128xf32>
    %92 = arith.mulf %91, %90 : vector<4x16x128xf32>
    %93 = arith.addf %88, %92 : vector<4x16x128xf32>
    %94 = vector.extract_strided_slice %89 {offsets = [0, 1, 0], sizes = [4, 16, 128], strides = [1, 1, 1]} : vector<4x20x128xf32> to vector<4x16x128xf32>
    %95 = vector.broadcast %9 : f32 to vector<4x16x128xf32>
    %96 = arith.mulf %95, %94 : vector<4x16x128xf32>
    %97 = arith.addf %93, %96 : vector<4x16x128xf32>
    %98 = vector.extract_strided_slice %89 {offsets = [0, 2, 0], sizes = [4, 16, 128], strides = [1, 1, 1]} : vector<4x20x128xf32> to vector<4x16x128xf32>
    %99 = vector.broadcast %14 : f32 to vector<4x16x128xf32>
    %100 = arith.mulf %99, %98 : vector<4x16x128xf32>
    %101 = arith.addf %97, %100 : vector<4x16x128xf32>
    %102 = vector.extract_strided_slice %89 {offsets = [0, 3, 0], sizes = [4, 16, 128], strides = [1, 1, 1]} : vector<4x20x128xf32> to vector<4x16x128xf32>
    %103 = vector.broadcast %19 : f32 to vector<4x16x128xf32>
    %104 = arith.mulf %103, %102 : vector<4x16x128xf32>
    %105 = arith.addf %101, %104 : vector<4x16x128xf32>
    %106 = vector.extract_strided_slice %89 {offsets = [0, 4, 0], sizes = [4, 16, 128], strides = [1, 1, 1]} : vector<4x20x128xf32> to vector<4x16x128xf32>
    %107 = vector.broadcast %24 : f32 to vector<4x16x128xf32>
    %108 = arith.mulf %107, %106 : vector<4x16x128xf32>
    %109 = arith.addf %105, %108 : vector<4x16x128xf32>
    %c124_i32 = arith.constant 124 : i32
    %110 = tpu.dynamic_rotate %0 by %c124_i32 dim 2 : vector<4x20x128xf32>, i32 -> vector<4x20x128xf32>
    %111 = vector.extract_strided_slice %110 {offsets = [0, 0, 0], sizes = [4, 16, 128], strides = [1, 1, 1]} : vector<4x20x128xf32> to vector<4x16x128xf32>
    %112 = vector.broadcast %5 : f32 to vector<4x16x128xf32>
    %113 = arith.mulf %112, %111 : vector<4x16x128xf32>
    %114 = arith.addf %109, %113 : vector<4x16x128xf32>
    %115 = vector.extract_strided_slice %110 {offsets = [0, 1, 0], sizes = [4, 16, 128], strides = [1, 1, 1]} : vector<4x20x128xf32> to vector<4x16x128xf32>
    %116 = vector.broadcast %10 : f32 to vector<4x16x128xf32>
    %117 = arith.mulf %116, %115 : vector<4x16x128xf32>
    %118 = arith.addf %114, %117 : vector<4x16x128xf32>
    %119 = vector.extract_strided_slice %110 {offsets = [0, 2, 0], sizes = [4, 16, 128], strides = [1, 1, 1]} : vector<4x20x128xf32> to vector<4x16x128xf32>
    %120 = vector.broadcast %15 : f32 to vector<4x16x128xf32>
    %121 = arith.mulf %120, %119 : vector<4x16x128xf32>
    %122 = arith.addf %118, %121 : vector<4x16x128xf32>
    %123 = vector.extract_strided_slice %110 {offsets = [0, 3, 0], sizes = [4, 16, 128], strides = [1, 1, 1]} : vector<4x20x128xf32> to vector<4x16x128xf32>
    %124 = vector.broadcast %20 : f32 to vector<4x16x128xf32>
    %125 = arith.mulf %124, %123 : vector<4x16x128xf32>
    %126 = arith.addf %122, %125 : vector<4x16x128xf32>
    %127 = vector.extract_strided_slice %110 {offsets = [0, 4, 0], sizes = [4, 16, 128], strides = [1, 1, 1]} : vector<4x20x128xf32> to vector<4x16x128xf32>
    %128 = vector.broadcast %25 : f32 to vector<4x16x128xf32>
    %129 = arith.mulf %128, %127 : vector<4x16x128xf32>
    %130 = arith.addf %126, %129 : vector<4x16x128xf32>
    %c0_48 = arith.constant 0 : index
    %c0_49 = arith.constant 0 : index
    %c0_50 = arith.constant 0 : index
    %131 = vector.load %arg3[%c0_48, %c0_49, %c0_50] : memref<4x16x128xf32, #tpu.memory_space<vmem>>, vector<4x16x128xf32>
    tpu.vector_store %arg3[%c0_48, %c0_49, %c0_50], %130 {strides = array<i32>} : memref<4x16x128xf32, #tpu.memory_space<vmem>>, vector<4x16x128xf32>,
    return
  }
  func.func @transform_0(%arg0: i32) -> (i32, i32) {
    %c0_i32 = arith.constant 0 : i32
    %c0_i32_0 = arith.constant 0 : i32
    %c0_i32_1 = arith.constant 0 : i32
    return %c0_i32, %c0_i32_0 : i32, i32
  }
  func.func @transform_1(%arg0: i32) -> (i32, i32, i32) {
    %c0_i32 = arith.constant 0 : i32
    %c0_i32_0 = arith.constant 0 : i32
    %c0_i32_1 = arith.constant 0 : i32
    return %arg0, %c0_i32, %c0_i32_0 : i32, i32, i32
  }
  func.func @transform_2(%arg0: i32) -> (i32, i32, i32) {
    %c0_i32 = arith.constant 0 : i32
    %c0_i32_0 = arith.constant 0 : i32
    %c0_i32_1 = arith.constant 0 : i32
    return %arg0, %c0_i32, %c0_i32_0 : i32, i32, i32
  }
}

</mosaic_0001>

<bundles_post_ra>
// kernel: tpu_custom_call.1
= control target key start
LH: loop header
LB: loop body
LE: loop exit
PB: predicated region body
PF: predicated region fallthrough
CT: control target
= control target key end

     0   :  { %7 = vsyncpa [#allocation4], 0  ;;  %s3248_s0 = inlined_call_operand.vmem [shape: f32[5,5], index: 0, kind: input, shape index: {}]   ;;  %s3249_s1 = inlined_call_operand.vmem [shape: f32[8,20,128], index: 1, kind: input, shape index: {}]   ;;  %s3250_s2 = inlined_call_operand.hbm [shape: f32[8,16,128], index: 2, kind: output, shape index: {}]  }
   0x1   :  { %8 = vsyncpa [#allocation3], 0 }
   0x2   :  { %10 = vsyncpa [#allocation3 + $0x1], 0  ;;  %s1905_s9 = smov 0   ;;  %s1907_s10 = smov 0  }
   0x3   :  { %s1909_s11 = smov 0   ;;  %s1911_s12 = smov 0  }
   0x4 LB: > { %s1926_s13 = sadd.s32 4294967295, %s1880_s12   ;;  %s1701_s14 = sadd.s32 4294967294, %s1880_s12   ;;  %s1880_s12 = sphi %s1911_s12, %s3283_s12   ;;  %s1876_s11 = sphi %s1909_s11, %s3282_s11   ;;  %s1872_s10 = sphi %s1907_s10, %s3281_s10   ;;  %s1868_s9 = sphi %s1905_s9, %s3280_s9  }
   0x5   : > { %s1930_s15 = sadd.s32 1, %s1880_s12   ;;  %s70_s16 = sadd.s32 1, %s1876_s11 }
   0x6   : > { %s67_s17 = ssub.s32 %s1880_s12, %s1930_s15  ;;  %p80_p0 = scmp.ne.s32.totalorder %s1876_s11, %s1872_s10 }
   0x7   : > { %p68_p1 = scmp.eq.s32.totalorder %s67_s17, 0  ;;  %p81_p2 = scmp.eq.s32.totalorder %s1926_s13, 1 }
   0x8   : > { %p86_p3 = scmp.ne.s32.totalorder %s1872_s10, %s1868_s9  ;;  %p87_p4 = scmp.eq.s32.totalorder %s1701_s14, 1 }
   0x9   : > { %s1941_s18 = scalar_select %p68_p1, %s1876_s11, %s70_s16  }
   0xa   : > { %p1943_p5 = por %p81_p2, %p80_p0  ;;  %p1947_p6 = por %p87_p4, %p86_p3 }
   0xb   : > { %p1702_p7 = scmp.ge.s32.totalorder %s1880_s12, 1  ;;  %p94_p8 = scmp.lt.s32.totalorder %s1880_s12, 3 }
   0xc   : > { %p1757_p9 = scmp.eq.s32.totalorder %s1926_s13, 0  ;;  %s107_s24 = sshll.u32 %s3248_s0, 4  ;;  %s108_s24 = int_to_ptr.vmem [resolvable:$true] %s107_s24 }
   0xd   : > { %p1954_p10 = pnand %p1702_p7, %p94_p8  ;;  %s1799_s25 = scalar_lea.vmem %s108_s24, 128 }
   0xe   : > { %p1800_p13 = scmp.ne.s32.totalorder %s108_s24, %s1799_s25  ;;  %p1807_p3 = scmp.lt.s32.totalorder %s108_s24, %s108_s24 }
   0xf   : > { %p1749_p11 = pneg %p1954_p10  ;;  %p1808_p4 = scmp.lt.s32.totalorder %s1799_s25, %s1799_s25 }
  0x11   : > { %p1750_p12 = pnand %p1757_p9, %p1749_p11  ;;  %p1809_p7 = por %p1808_p4, %p1807_p3 }
  0x13   : > { %p1801_p0 = pneg %p1750_p12 }
  0x15   : > { %p1802_p1 = pnand %p1801_p0, %p1800_p13 }
  0x17   : > { %p1803_p2 = pneg %p1802_p1 }
  0x19   : > { %p1810_p8 = pnand %p1809_p7, %p1803_p2 }
  0x1b   : > { %1813 = shalt.err (!%p1810_p8)
}
  0x1c   : > { %s1882_s26 = smov [#allocation2]   ;;  %130 = sbr.rel (%p1954_p10) target bundleno = 361 (0x169), region = 28 }
  0x1d   : > { %1752 = dma.vmem_to_smem (!%p1750_p12), %s108_s24, 128, %s1882_s26, [#allocation4]  }
  0x23   : > { %1859 = dma.done.wait (%p1757_p9), [#allocation4], 128  }
  0x24   : > { %1861 = vsyncadd (%p1757_p9), [#allocation4], 4294967168 }
  0x25   : > { %136 = sfence }
  0x26   : > { %s1708_s27 = sshll.u32 %s1926_s13, 2  ;;  %s1883_s4 = smov 127   ;;  %vm241_vm0 = vcmask 1046528   ;;  %vm303_vm1 = vcmask 1045504   ;;  %vm365_vm2 = vcmask 1044480   ;;  %vm427_vm3 = vcmask 1043456  }
  0x27   : > { %p155_p11 = scmp.lt.s32.totalorder %s1708_s27, 7  ;;  %s1884_s5 = smov 126  }
  0x28   : > { %s1885_s6 = smov 125   ;;  %s1714_s7 = sld [smem:[#allocation2 + $0x80]] }
  0x29   : > { %s3285_s27 = smov (!%p155_p11, %s1708_s27), 7  ;;  %s1719_s8 = sld [smem:[#allocation2 + $0x100]] }
  0x2a   : > { %s1742_s28 = smul.u32 24, %s3285_s27  ;;  %s174_s14 = sld [smem:[#allocation2]] }
  0x2b   : > { %s1724_s16 = sld [smem:[#allocation2 + $0x180]]  ;;  %s1886_s21 = smov 124  }
  0x2c   : > { %s159_s3 = scalar_lea.vmem %s3249_s1, %s1742_s28  ;;  %s1729_s17 = sld [smem:[#allocation2 + $0x200]] }
  0x2d   : > { %v1975_v0 = vld [vmem:[%s159_s3 + $0x10] sm:$0xf]  ;;  %v1977_v1 = vld [vmem:[%s159_s3] sm:$0xff]  ;;  %v1981_v2 = vld [vmem:[%s159_s3 + $0x18] sm:$0xff]  ;;  %s2066_s22 = sld [smem:[#allocation2 + $0x81]]  ;;  %s2289_s27 = sld [smem:[#allocation2 + $0x2]] }
  0x2e   : > { %468 = vrot.lane.b32.xlu1 %v1975_v0, %s1883_s4  ;;  %464 = vrot.lane.b32.xlu0 %v1977_v1, %s1883_s4  ;;  %v1983_v3 = vld [vmem:[%s159_s3 + $0x8] sm:$0xff]  ;;  %v1989_v5 = vld [vmem:[%s159_s3 + $0x20] sm:$0xff]  ;;  %s2099_s23 = sld [smem:[#allocation2 + $0x101]]  ;;  %s2294_s28 = sld [smem:[#allocation2 + $0x82]] }
  0x2f   : > { %v1987_v4 = vld [vmem:[%s159_s3 + $0x28] sm:$0xf]  ;;  %v1993_v6 = vld [vmem:[%s159_s3 + $0x38] sm:$0xff]  ;;  %v1995_v7 = vld [vmem:[%s159_s3 + $0x30] sm:$0xff]  ;;  %v2031_v12 = vstv %s1714_s7  ;;  %s2276_s24 = sld [smem:[#allocation2 + $0x181]]  ;;  %s2296_s29 = sld [smem:[#allocation2 + $0x102]] }
  0x30   : > { %v1999_v8 = vld [vmem:[%s159_s3 + $0x48] sm:$0xff]  ;;  %v2001_v9 = vld [vmem:[%s159_s3 + $0x40] sm:$0xf]  ;;  %v2005_v10 = vld [vmem:[%s159_s3 + $0x58] sm:$0xf]  ;;  %v2037_v13 = vmul.f32 %v2031_v12, %v1983_v3  ;;  %v2039_v14 = vstv %s1719_s8  ;;  %v217_v15 = vmul.f32 %v2031_v12, %v1977_v1  ;;  %v220_v19 = vmul.f32 %v2031_v12, %v1981_v2  ;;  %s2278_s25 = sld [smem:[#allocation2 + $0x201]] }
  0x31   : > { %v2007_v11 = vld [vmem:[%s159_s3 + $0x50] sm:$0xff]  ;;  %v2045_v16 = vstv %s174_s14  ;;  %v2049_v17 = vmul.f32 %v2039_v14, %v1983_v3  ;;  %v2051_v18 = vstv %s1724_s16  ;;  %v279_v22 = vmul.f32 %v2039_v14, %v1977_v1  ;;  %s2283_s26 = sld [smem:[#allocation2 + $0x1]]  ;;  %s2306_s30 = sld [smem:[#allocation2 + $0x182]] }
  0x32   : > { %470 = vrot.lane.b32.xlu1 %v1981_v2, %s1883_s4  ;;  %466 = vrot.lane.b32.xlu0 %v1983_v3, %s1883_s4  ;;  %v243_v20 = vrot.slane %v2037_v13, 1  ;;  %v242_v21 = vrot.slane %v217_v15, 1  ;;  %v2060_v23 = vmul.f32 %v2031_v12, %v1989_v5  ;;  %v2071_v25 = vmul.f32 %v2051_v18, %v1983_v3  ;;  %s2308_s3 = sld [smem:[#allocation2 + $0x202]]  ;;  %s2331_s7 = sld [smem:[#allocation2 + $0x183]] }
  0x33   : > { %v305_v24 = vrot.slane %v2049_v17, 2  ;;  %v200_v26 = vmul.f32 %v2045_v16, %v1977_v1  ;;  %v341_v27 = vmul.f32 %v2051_v18, %v1977_v1  ;;  %v304_v29 = vrot.slane %v279_v22, 2  ;;  %s2333_s8 = sld [smem:[#allocation2 + $0x203]]  ;;  %s2922_s14 = sld [smem:[#allocation2 + $0x84]] }
  0x34   : > { %v244_v28 = vsel %vm241_vm0, %v242_v21, %v243_v20  ;;  %v247_v30 = vrot.slane %v220_v19, 1  ;;  %v248_v31 = vrot.slane %v2060_v23, 1  ;;  %v282_v32 = vmul.f32 %v2039_v14, %v1981_v2  ;;  %s2924_s16 = sld [smem:[#allocation2 + $0x104]] }
  0x35   : > { %v2085_v33 = vmul.f32 %v2039_v14, %v1989_v5  ;;  %v2087_v34 = vstv %s1729_s17  ;;  %v202_v35 = vmul.f32 %v2045_v16, %v1981_v2  ;;  %v2093_v36 = vmul.f32 %v2045_v16, %v1983_v3  ;;  %s2930_s17 = sld [smem:[#allocation2 + $0x4]] }
  0x36   : > { %474 = vrot.lane.b32.xlu1 %v1987_v4, %s1883_s4  ;;  %472 = vrot.lane.b32.xlu0 %v1989_v5, %s1883_s4  ;;  %v367_v37 = vrot.slane %v2071_v25, 3  ;;  %v270_v38 = vadd.f32 %v244_v28, %v200_v26  ;;  %v366_v39 = vrot.slane %v341_v27, 3  ;;  %v2104_v40 = vmul.f32 %v2045_v16, %v1989_v5 }
  0x37   : > { %v306_v41 = vsel %vm303_vm1, %v304_v29, %v305_v24  ;;  %v249_v42 = vsel %vm241_vm0, %v247_v30, %v248_v31  ;;  %v344_v43 = vmul.f32 %v2051_v18, %v1981_v2  ;;  %v2116_v44 = vmul.f32 %v2051_v18, %v1989_v5 }
  0x38   : > { %v2120_v45 = vmul.f32 %v2087_v34, %v1983_v3  ;;  %v309_v46 = vrot.slane %v282_v32, 2  ;;  %v310_v47 = vrot.slane %v2085_v33, 2  ;;  %v219_v48 = vmul.f32 %v2031_v12, %v1975_v0 }
  0x39   : > { %v403_v49 = vmul.f32 %v2087_v34, %v1977_v1  ;;  %v222_v50 = vmul.f32 %v2031_v12, %v1987_v4  ;;  %v2131_v51 = vmul.f32 %v2045_v16, %v1993_v6  ;;  %v2135_v52 = vmul.f32 %v2045_v16, %v1995_v7 }
  0x3a   : > { %478 = vrot.lane.b32.xlu1 %v1993_v6, %s1883_s4  ;;  %476 = vrot.lane.b32.xlu0 %v1995_v7, %s1883_s4  ;;  %v2142_v53 = vstv %s2066_s22  ;;  %v332_v54 = vadd.f32 %v306_v41, %v270_v38  ;;  %v368_v55 = vsel %vm365_vm2, %v366_v39, %v367_v37  ;;  %v272_v56 = vadd.f32 %v249_v42, %v202_v35  ;;  %s2942_s22 = sld [smem:[#allocation2 + $0x204]] }
  0x3b   : > { %v371_v57 = vrot.slane %v344_v43, 3  ;;  %v372_v58 = vrot.slane %v2116_v44, 3  ;;  %v406_v59 = vmul.f32 %v2087_v34, %v1981_v2  ;;  %v2152_v60 = vmul.f32 %v2087_v34, %v1989_v5 }
  0x3c   : > { %v429_v61 = vrot.slane %v2120_v45, 4  ;;  %v311_v62 = vsel %vm303_vm1, %v309_v46, %v310_v47  ;;  %v245_v63 = vrot.slane %v219_v48, 1  ;;  %v343_v15 = vmul.f32 %v2051_v18, %v1975_v0 }
  0x3d   : > { %v250_v19 = vrot.slane %v222_v50, 1  ;;  %v2169_v21 = vadd.f32 %v368_v55, %v332_v54  ;;  %v224_v22 = vmul.f32 %v2031_v12, %v1993_v6  ;;  %v225_v26 = vmul.f32 %v2031_v12, %v2001_v9 }
  0x3e   : > { %482 = vrot.lane.b32.xlu1 %v1999_v8, %s1883_s4  ;;  %480 = vrot.lane.b32.xlu0 %v2001_v9, %s1883_s4  ;;  %v334_v27 = vadd.f32 %v311_v62, %v272_v56  ;;  %v373_v28 = vsel %vm365_vm2, %v371_v57, %v372_v58  ;;  %v433_v29 = vrot.slane %v406_v59, 4  ;;  %v434_v30 = vrot.slane %v2152_v60, 4 }
  0x3f   : > { %v246_v32 = vsel %vm241_vm0, %v243_v20, %v245_v63  ;;  %v2182_v35 = vmul.f32 %v2087_v34, %v1975_v0  ;;  %v346_v38 = vmul.f32 %v2051_v18, %v1987_v4  ;;  %v369_v41 = vrot.slane %v343_v15, 3 }
  0x40   : > { %v251_v13 = vsel %vm241_vm0, %v248_v31, %v250_v19  ;;  %v255_v20 = vrot.slane %v225_v26, 1  ;;  %v286_v43 = vmul.f32 %v2039_v14, %v1993_v6  ;;  %v287_v44 = vmul.f32 %v2039_v14, %v2001_v9 }
  0x41   : > { %v2202_v46 = vadd.f32 %v373_v28, %v334_v27  ;;  %v2207_v23 = vsel %vm427_vm3, %v433_v29, %v434_v30  ;;  %v271_v31 = vadd.f32 %v246_v32, %v2093_v36  ;;  %v223_v48 = vmul.f32 %v2031_v12, %v1995_v7 }
  0x42   : > { %486 = vrot.lane.b32.xlu1 %v2005_v10, %s1883_s4  ;;  %484 = vrot.lane.b32.xlu0 %v2007_v11, %s1883_s4  ;;  %v431_v50 = vrot.slane %v2182_v35, 4  ;;  %v374_v54 = vrot.slane %v346_v38, 3  ;;  %v2218_v55 = vmul.f32 %v2087_v34, %v1987_v4  ;;  %v2223_v56 = vsel %vm365_vm2, %v367_v37, %v369_v41  ;;  %s2317_s4 = sld [smem:[#allocation2 + $0x3]] }
  0x43   : > { %v273_v36 = vadd.f32 %v251_v13, %v2104_v40  ;;  %v348_v17 = vmul.f32 %v2051_v18, %v1993_v6  ;;  %v317_v25 = vrot.slane %v287_v44, 2  ;;  %v285_v37 = vmul.f32 %v2039_v14, %v1995_v7 }
  0x44   : > { %v252_v40 = vrot.slane %v223_v48, 1  ;;  %v227_v62 = vmul.f32 %v2031_v12, %v2007_v11  ;;  %v375_v63 = vsel %vm365_vm2, %v372_v58, %v374_v54  ;;  %v228_v15 = vmul.f32 %v2031_v12, %v2005_v10 }
  0x45   : > { %v347_v26 = vmul.f32 %v2051_v18, %v1995_v7  ;;  %v410_v58 = vmul.f32 %v2087_v34, %v1993_v6  ;;  %v314_v28 = vrot.slane %v285_v37, 2  ;;  %v288_v29 = vmul.f32 %v2039_v14, %v1999_v8 }
  0x46   : > { %751 = vrot.lane.b32.xlu1 %v1983_v3, %s1884_s5  ;;  %749 = vrot.lane.b32.xlu0 %v1977_v1, %s1884_s5  ;;  %v411_v41 = vmul.f32 %v2087_v34, %v2001_v9  ;;  %v260_v13 = vrot.slane %v228_v15, 1  ;;  %v2325_v60 = vstv %s2276_s24 }
  0x47   : > { %v319_v48 = vrot.slane %v288_v29, 2 }
  0x4a   : > { %755 = vrot.lane.b32.xlu1 %v1981_v2, %s1884_s5  ;;  %753 = vrot.lane.b32.xlu0 %v1975_v0, %s1884_s5 }
  0x4e   : > { %759 = vrot.lane.b32.xlu1 %v1987_v4, %s1884_s5  ;;  %757 = vrot.lane.b32.xlu0 %v1989_v5, %s1884_s5 }
  0x52   : > { %763 = vrot.lane.b32.xlu1 %v1993_v6, %s1884_s5  ;;  %761 = vrot.lane.b32.xlu0 %v1995_v7, %s1884_s5 }
  0x56   : > { %767 = vrot.lane.b32.xlu1 %v1999_v8, %s1884_s5  ;;  %765 = vrot.lane.b32.xlu0 %v2001_v9, %s1884_s5 }
  0x5a   : > { %771 = vrot.lane.b32.xlu1 %v2005_v10, %s1884_s5  ;;  %769 = vrot.lane.b32.xlu0 %v2007_v11, %s1884_s5  ;;  %s2320_s5 = sld [smem:[#allocation2 + $0x83]] }
  0x5e   : > { %1036 = vrot.lane.b32.xlu1 %v1983_v3, %s1885_s6  ;;  %1034 = vrot.lane.b32.xlu0 %v1977_v1, %s1885_s6 }
  0x62   : > { %1040 = vrot.lane.b32.xlu1 %v1981_v2, %s1885_s6  ;;  %1038 = vrot.lane.b32.xlu0 %v1975_v0, %s1885_s6 }
  0x66   : > { %1044 = vrot.lane.b32.xlu1 %v1987_v4, %s1885_s6  ;;  %1042 = vrot.lane.b32.xlu0 %v1989_v5, %s1885_s6 }
  0x6a   : > { %1048 = vrot.lane.b32.xlu1 %v1993_v6, %s1885_s6  ;;  %1046 = vrot.lane.b32.xlu0 %v1995_v7, %s1885_s6 }
  0x6e   : > { %1052 = vrot.lane.b32.xlu1 %v1999_v8, %s1885_s6  ;;  %1050 = vrot.lane.b32.xlu0 %v2001_v9, %s1885_s6 }
  0x72   : > { %1056 = vrot.lane.b32.xlu1 %v2005_v10, %s1885_s6  ;;  %1054 = vrot.lane.b32.xlu0 %v2007_v11, %s1885_s6  ;;  %s2322_s6 = sld [smem:[#allocation2 + $0x103]] }
  0x76   : > { %1321 = vrot.lane.b32.xlu1 %v1983_v3, %s1886_s21  ;;  %1319 = vrot.lane.b32.xlu0 %v1977_v1, %s1886_s21  ;;  %v281_v1 = vmul.f32 %v2039_v14, %v1975_v0  ;;  %v428_v3 = vrot.slane %v403_v49, 4 }
  0x78   : > { %v307_v33 = vrot.slane %v281_v1, 2  ;;  %v2189_v39 = vsel %vm427_vm3, %v428_v3, %v429_v61  ;;  %v436_v1 = vrot.slane %v2218_v55, 4  ;;  %v349_v3 = vmul.f32 %v2051_v18, %v2001_v9 }
  0x79   : > { %v456_v29 = vadd.f32 %v2189_v39, %v2169_v21 }
  0x7a   : > { %1325 = vrot.lane.b32.xlu1 %v1981_v2, %s1886_s21  ;;  %1323 = vrot.lane.b32.xlu0 %v1975_v0, %s1886_s21  ;;  %v284_v2 = vmul.f32 %v2039_v14, %v1987_v4  ;;  %v253_v0 = vrot.slane %v224_v22, 1  ;;  %v308_v49 = vsel %vm303_vm1, %v305_v24, %v307_v33  ;;  %v315_v24 = vrot.slane %v286_v43, 2 }
  0x7b   : > { %v2236_v59 = vadd.f32 %v308_v49, %v271_v31  ;;  %v377_v22 = vrot.slane %v348_v17, 3  ;;  %v379_v38 = vrot.slane %v349_v3, 3  ;;  %v409_v43 = vmul.f32 %v2087_v34, %v1995_v7 }
  0x7c   : > { %v312_v42 = vrot.slane %v284_v2, 2  ;;  %v318_v27 = vsel %vm303_vm1, %v315_v24, %v317_v25  ;;  %v254_v32 = vsel %vm241_vm0, %v252_v40, %v253_v0  ;;  %v316_v31 = vsel %vm303_vm1, %v314_v28, %v315_v24 }
  0x7d   : > { %v274_v44 = vadd.f32 %v254_v32, %v2135_v52  ;;  %v439_v52 = vrot.slane %v410_v58, 4  ;;  %v380_v17 = vsel %vm365_vm2, %v377_v22, %v379_v38  ;;  %v438_v25 = vrot.slane %v409_v43, 4 }
  0x7e   : > { %1329 = vrot.lane.b32.xlu1 %v1987_v4, %s1886_s21  ;;  %1327 = vrot.lane.b32.xlu0 %v1989_v5, %s1886_s21  ;;  %v2167_v5 = vstv %s2099_s23  ;;  %v313_v57 = vsel %vm303_vm1, %v310_v47, %v312_v42  ;;  %v256_v4 = vsel %vm241_vm0, %v253_v0, %v255_v20  ;;  %v226_v47 = vmul.f32 %v2031_v12, %v1999_v8  ;;  %s151_s23 = sand.u32 1, %s1872_s10  }
  0x7f   : > { %v335_v19 = vadd.f32 %v313_v57, %v273_v36  ;;  %v275_v2 = vadd.f32 %v256_v4, %v2131_v51  ;;  %v258_v12 = vrot.slane %v227_v62, 1  ;;  %v289_v51 = vmul.f32 %v2039_v14, %v2007_v11  ;;  %s1707_s24 = sshll.u32 %s151_s23, 6 }
  0x80   : > { %v257_v33 = vrot.slane %v226_v47, 1  ;;  %v290_v42 = vmul.f32 %v2039_v14, %v2005_v10  ;;  %v376_v20 = vrot.slane %v347_v26, 3  ;;  %v206_v0 = vmul.f32 %v2045_v16, %v1999_v8 }
  0x81   : > { %v320_v54 = vrot.slane %v289_v51, 2  ;;  %v351_v14 = vmul.f32 %v2051_v18, %v2007_v11  ;;  %v261_v55 = vsel %vm241_vm0, %v258_v12, %v260_v13  ;;  %v352_v57 = vmul.f32 %v2051_v18, %v2005_v10 }
  0x82   : > { %1333 = vrot.lane.b32.xlu1 %v1993_v6, %s1886_s21  ;;  %1331 = vrot.lane.b32.xlu0 %v1995_v7, %s1886_s21  ;;  %v337_v6 = vadd.f32 %v318_v27, %v275_v2  ;;  %v259_v49 = vsel %vm241_vm0, %v257_v33, %v258_v12  ;;  %v207_v7 = vmul.f32 %v2045_v16, %v2007_v11  ;;  %v322_v36 = vrot.slane %v290_v42, 2 }
  0x83   : > { %v441_v4 = vrot.slane %v411_v41, 4  ;;  %v378_v24 = vsel %vm365_vm2, %v376_v20, %v377_v22  ;;  %v336_v16 = vadd.f32 %v316_v31, %v274_v44  ;;  %v276_v37 = vadd.f32 %v259_v49, %v206_v0 }
  0x84   : > { %v412_v47 = vmul.f32 %v2087_v34, %v1999_v8  ;;  %v321_v62 = vsel %vm303_vm1, %v319_v48, %v320_v54  ;;  %v382_v3 = vrot.slane %v351_v14, 3  ;;  %v277_v15 = vadd.f32 %v261_v55, %v207_v7 }
  0x85   : > { %v432_v2 = vsel %vm427_vm3, %v429_v61, %v431_v50  ;;  %v384_v22 = vrot.slane %v352_v57, 3  ;;  %v414_v26 = vmul.f32 %v2087_v34, %v2005_v10  ;;  %v397_v35 = vadd.f32 %v375_v63, %v335_v19 }
  0x86   : > { %1337 = vrot.lane.b32.xlu1 %v1999_v8, %s1886_s21  ;;  %1335 = vrot.lane.b32.xlu0 %v2001_v9, %s1886_s21  ;;  %v350_v9 = vmul.f32 %v2051_v18, %v1999_v8  ;;  %v413_v18 = vmul.f32 %v2087_v34, %v2007_v11  ;;  %v323_v8 = vsel %vm303_vm1, %v320_v54, %v322_v36  ;;  %v443_v28 = vrot.slane %v412_v47, 4 }
  0x87   : > { %v437_v45 = vsel %vm427_vm3, %v434_v30, %v436_v1  ;;  %v399_v61 = vadd.f32 %v380_v17, %v337_v6  ;;  %v442_v50 = vsel %vm427_vm3, %v439_v52, %v441_v4  ;;  %v398_v27 = vadd.f32 %v378_v24, %v336_v16 }
  0x88   : > { %v381_v40 = vrot.slane %v350_v9, 3  ;;  %v338_v34 = vadd.f32 %v321_v62, %v276_v37  ;;  %v2328_v30 = vstv %s2278_s25  ;;  %v385_v63 = vsel %vm365_vm2, %v382_v3, %v384_v22  ;;  %s3075_s25 = scalar_lea.vmem [#allocation5], %s1707_s24 }
  0x89   : > { %v446_v1 = vrot.slane %v414_v26, 4  ;;  %v2336_v19 = vstv %s2283_s26  ;;  %v458_v32 = vadd.f32 %v2207_v23, %v2202_v46  ;;  %v2342_v12 = vadd.f32 %v437_v45, %v397_v35  ;;  %s1741_s26 = sshll.u32 %s1926_s13, 10  ;;  %s3207_s13 = scalar_lea.sflag [#allocation3], %s151_s23 }
  0x8a   : > { %1341 = vrot.lane.b32.xlu1 %v2005_v10, %s1886_s21  ;;  %1339 = vrot.lane.b32.xlu0 %v2007_v11, %s1886_s21  ;;  %v395_v11 = vadd.f32 %v2223_v56, %v2236_v59  ;;  %v440_v10 = vsel %vm427_vm3, %v438_v25, %v439_v52  ;;  %v383_v58 = vsel %vm365_vm2, %v381_v40, %v382_v3  ;;  %v444_v56 = vrot.slane %v413_v18, 4  ;;  %s2940_s21 = sld [smem:[#allocation2 + $0x184]] }
  0x8b   : > { %v339_v59 = vadd.f32 %v323_v8, %v277_v15  ;;  %v2344_v51 = vadd.f32 %v442_v50, %v399_v61  ;;  %v2346_v38 = vadd.f32 %v440_v10, %v398_v27  ;;  %v400_v41 = vadd.f32 %v383_v58, %v338_v34 }
  0x8c   : > { %v457_v33 = vadd.f32 %v432_v2, %v395_v11  ;;  %v445_v13 = vsel %vm427_vm3, %v443_v28, %v444_v56  ;;  %v2350_v6 = vstv %s2289_s27  ;;  %v2353_v20 = vstv %s2294_s28  ;;  %s1627_s27 = sshll.u32 %s3075_s25, 4  ;;  %s3201_s27 = int_to_ptr.vmem [resolvable:$true] %s1627_s27 }
  0x8d   : > { %v401_v42 = vadd.f32 %v385_v63, %v339_v59  ;;  %v447_v46 = vsel %vm427_vm3, %v444_v56, %v446_v1  ;;  %v2357_v23 = vstv %s2296_s29  ;;  %v2360_v43 = vstv %s2306_s30  ;;  %s3199_s30 = scalar_lea.hbm %s3250_s2, %s1741_s26 }
  0x8e   : > { %v2363_v0 = vstv %s2308_s3  ;;  %v2378_v7 = vadd.f32 %v445_v13, %v400_v41  ;;  %v2383_v55 = vstv %s2317_s4  ;;  %v2386_v36 = vstv %s2320_s5  ;;  %s1814_s3 = scalar_lea.vmem %s3201_s27, 1024  ;;  %s1887_s4 = smov [#allocation5]  }
  0x8f   : > { %v2380_v52 = vadd.f32 %v447_v46, %v401_v42  ;;  %v2389_v57 = vstv %s2322_s6  ;;  %v2393_v16 = vstv %s2331_s7  ;;  %v2396_v37 = vstv %s2333_s8  ;;  %p1815_p9 = scmp.ne.s32.totalorder %s3201_s27, %s1814_s3  ;;  %s1818_s5 = sshll.u32 %s1887_s4, 4  ;;  %s1819_s5 = int_to_ptr.vmem [resolvable:$false] %s1818_s5 }
  0x90   : > { %s1820_s6 = scalar_lea.vmem %s1819_s5, 2048  ;;  %p1821_p13 = scmp.lt.s32.totalorder %s3201_s27, %s1819_s5 }
  0x91   : > { %p1816_p10 = pnand %p1815_p9, %p1943_p5  ;;  %p1822_p0 = scmp.lt.s32.totalorder %s1820_s6, %s1814_s3 }
  0x93   : > { %p1817_p12 = pneg %p1816_p10  ;;  %p1823_p1 = por %p1822_p0, %p1821_p13 }
  0x95   : > { %p1824_p2 = pnand %p1823_p1, %p1817_p12 }
  0xa0   : > { %v469_v21 = vpop.permute.xlu1 %468  ;;  %v465_v39 = vpop.permute.xlu0 %464 }
  0xa1   : > { %v508_v44 = vmul.f32 %v2142_v53, %v469_v21  ;;  %v2367_v31 = vmul.f32 %v2167_v5, %v469_v21  ;;  %v2370_v48 = vmul.f32 %v2325_v60, %v469_v21  ;;  %v2373_v9 = vmul.f32 %v2328_v30, %v469_v21 }
  0xa2   : > { %v489_v49 = vmul.f32 %v2336_v19, %v465_v39  ;;  %v506_v54 = vmul.f32 %v2142_v53, %v465_v39  ;;  %v567_v14 = vmul.f32 %v2167_v5, %v465_v39  ;;  %v628_v4 = vmul.f32 %v2325_v60, %v465_v39 }
  0xa3   : > { %v533_v17 = vrot.slane %v508_v44, 1  ;;  %v594_v40 = vrot.slane %v2367_v31, 2  ;;  %v655_v47 = vrot.slane %v2370_v48, 3  ;;  %v2404_v22 = vmul.f32 %v2328_v30, %v465_v39 }
  0xa4   : > { %v471_v24 = vpop.permute.xlu1 %470  ;;  %v467_v25 = vpop.permute.xlu0 %466  ;;  %v497_v3 = vadd.f32 %v489_v49, %v456_v29  ;;  %v530_v18 = vrot.slane %v506_v54, 1  ;;  %v591_v15 = vrot.slane %v567_v14, 2 }
  0xa5   : > { %v490_v2 = vmul.f32 %v2336_v19, %v467_v25  ;;  %v507_v8 = vmul.f32 %v2142_v53, %v467_v25  ;;  %v491_v26 = vmul.f32 %v2336_v19, %v471_v24  ;;  %v509_v11 = vmul.f32 %v2142_v53, %v471_v24 }
  0xa6   : > { %v570_v35 = vmul.f32 %v2167_v5, %v471_v24  ;;  %v2410_v45 = vmul.f32 %v2325_v60, %v471_v24  ;;  %v2413_v61 = vmul.f32 %v2328_v30, %v471_v24  ;;  %v568_v34 = vmul.f32 %v2167_v5, %v467_v25 }
  0xa7   : > { %v498_v50 = vadd.f32 %v490_v2, %v457_v33  ;;  %v531_v27 = vrot.slane %v507_v8, 1  ;;  %v629_v58 = vmul.f32 %v2325_v60, %v467_v25  ;;  %v2418_v28 = vmul.f32 %v2328_v30, %v467_v25 }
  0xa8   : > { %v475_v10 = vpop.permute.xlu1 %474  ;;  %v652_v33 = vrot.slane %v628_v4, 3  ;;  %v499_v13 = vadd.f32 %v491_v26, %v458_v32  ;;  %v535_v42 = vrot.slane %v509_v11, 1  ;;  %v473_v21 = vpop.permute.xlu0 %472  ;;  %v596_v39 = vrot.slane %v570_v35, 2 }
  0xa9   : > { %v511_v56 = vmul.f32 %v2142_v53, %v475_v10  ;;  %v532_v59 = vsel %vm241_vm0, %v530_v18, %v531_v27  ;;  %v534_v63 = vsel %vm241_vm0, %v531_v27, %v533_v17  ;;  %v572_v1 = vmul.f32 %v2167_v5, %v475_v10 }
  0xaa   : > { %v633_v29 = vmul.f32 %v2325_v60, %v475_v10  ;;  %v657_v46 = vrot.slane %v2410_v45, 3  ;;  %v592_v31 = vrot.slane %v568_v34, 2  ;;  %v558_v48 = vadd.f32 %v532_v59, %v497_v3 }
  0xab   : > { %v559_v49 = vadd.f32 %v534_v63, %v498_v50  ;;  %v653_v54 = vrot.slane %v629_v58, 3  ;;  %v538_v24 = vrot.slane %v511_v56, 1  ;;  %v599_v25 = vrot.slane %v572_v1, 2 }
  0xac   : > { %v479_v17 = vpop.permute.xlu1 %478  ;;  %v660_v4 = vrot.slane %v633_v29, 3  ;;  %v492_v18 = vmul.f32 %v2336_v19, %v473_v21  ;;  %v2431_v32 = vmul.f32 %v2328_v30, %v475_v10  ;;  %v510_v2 = vmul.f32 %v2142_v53, %v473_v21  ;;  %v477_v63 = vpop.permute.xlu0 %476 }
  0xad   : > { %v571_v8 = vmul.f32 %v2167_v5, %v473_v21  ;;  %v632_v26 = vmul.f32 %v2325_v60, %v473_v21  ;;  %v593_v3 = vsel %vm303_vm1, %v591_v15, %v592_v31  ;;  %v2438_v11 = vmul.f32 %v2328_v30, %v473_v21 }
  0xae   : > { %v494_v35 = vmul.f32 %v2336_v19, %v479_v17  ;;  %v2442_v45 = vmul.f32 %v2142_v53, %v479_v17  ;;  %v595_v50 = vsel %vm303_vm1, %v592_v31, %v594_v40  ;;  %v2446_v27 = vsel %vm365_vm2, %v652_v33, %v653_v54 }
  0xaf   : > { %v536_v10 = vrot.slane %v510_v2, 1  ;;  %v597_v34 = vrot.slane %v571_v8, 2  ;;  %v2448_v58 = vadd.f32 %v593_v3, %v558_v48  ;;  %v2450_v56 = vadd.f32 %v595_v50, %v559_v49 }
  0xb0   : > { %v2453_v15 = vsel %vm365_vm2, %v653_v54, %v655_v47  ;;  %v500_v59 = vadd.f32 %v492_v18, %v2342_v12  ;;  %v658_v33 = vrot.slane %v632_v26, 3  ;;  %v502_v31 = vadd.f32 %v494_v35, %v2344_v51  ;;  %v483_v26 = vpop.permute.xlu1 %482 }
  0xb1   : > { %v537_v29 = vsel %vm241_vm0, %v535_v42, %v536_v10  ;;  %v539_v40 = vsel %vm241_vm0, %v536_v10, %v538_v24  ;;  %v541_v48 = vrot.slane %v2442_v45, 1  ;;  %v574_v49 = vmul.f32 %v2167_v5, %v479_v17 }
  0xb2   : > { %v598_v47 = vsel %vm303_vm1, %v596_v39, %v597_v34  ;;  %v600_v12 = vsel %vm303_vm1, %v597_v34, %v599_v25  ;;  %v635_v54 = vmul.f32 %v2325_v60, %v479_v17  ;;  %v493_v18 = vmul.f32 %v2336_v19, %v477_v63 }
  0xb3   : > { %v560_v42 = vadd.f32 %v537_v29, %v499_v13  ;;  %v561_v2 = vadd.f32 %v539_v40, %v500_v59  ;;  %v512_v24 = vmul.f32 %v2142_v53, %v477_v63  ;;  %v573_v8 = vmul.f32 %v2167_v5, %v477_v63 }
  0xb4   : > { %v2470_v51 = vsel %vm365_vm2, %v657_v46, %v658_v33  ;;  %v2473_v3 = vmul.f32 %v2328_v30, %v479_v17  ;;  %v634_v39 = vmul.f32 %v2325_v60, %v477_v63  ;;  %v2477_v25 = vmul.f32 %v2328_v30, %v477_v63  ;;  %v481_v17 = vpop.permute.xlu0 %480 }
  0xb5   : > { %v2480_v35 = vsel %vm365_vm2, %v658_v33, %v660_v4  ;;  %v602_v13 = vrot.slane %v574_v49, 2  ;;  %v501_v45 = vadd.f32 %v493_v18, %v2346_v38  ;;  %v540_v50 = vrot.slane %v512_v24, 1  ;;  %v487_v24 = vpop.permute.xlu1 %486 }
  0xb6   : > { %v663_v10 = vrot.slane %v635_v54, 3  ;;  %v601_v34 = vrot.slane %v573_v8, 2  ;;  %v495_v46 = vmul.f32 %v2336_v19, %v483_v26  ;;  %v515_v59 = vmul.f32 %v2142_v53, %v483_v26 }
  0xb7   : > { %v2485_v29 = vadd.f32 %v598_v47, %v560_v42  ;;  %v542_v40 = vsel %vm241_vm0, %v540_v50, %v541_v48  ;;  %v662_v63 = vrot.slane %v634_v39, 3  ;;  %v2489_v1 = vmul.f32 %v2167_v5, %v483_v26 }
  0xb8   : > { %v2491_v4 = vadd.f32 %v600_v12, %v561_v2  ;;  %v724_v38 = vrot.slane %v2473_v3, 4  ;;  %v637_v49 = vmul.f32 %v2325_v60, %v483_v26  ;;  %v562_v54 = vadd.f32 %v542_v40, %v501_v45 }
  0xb9   : > { %v514_v18 = vmul.f32 %v2142_v53, %v481_v17  ;;  %v575_v47 = vmul.f32 %v2167_v5, %v481_v17  ;;  %v636_v42 = vmul.f32 %v2325_v60, %v481_v17  ;;  %v603_v8 = vsel %vm303_vm1, %v601_v34, %v602_v13  ;;  %v485_v34 = vpop.permute.xlu0 %484 }
  0xba   : > { %v503_v39 = vadd.f32 %v495_v46, %v2378_v7  ;;  %v545_v12 = vrot.slane %v515_v59, 1  ;;  %v697_v2 = vmul.f32 %v2328_v30, %v481_v17  ;;  %v2503_v50 = vsel %vm365_vm2, %v662_v63, %v663_v10 }
  0xbb   : > { %v606_v33 = vrot.slane %v2489_v1, 2  ;;  %v543_v45 = vrot.slane %v514_v18, 1  ;;  %v604_v40 = vrot.slane %v575_v47, 2  ;;  %v667_v44 = vrot.slane %v637_v49, 3 }
  0xbc   : > { %v2507_v21 = vmul.f32 %v2328_v30, %v483_v26  ;;  %v665_v41 = vrot.slane %v636_v42, 3  ;;  %v517_v14 = vmul.f32 %v2142_v53, %v487_v24  ;;  %v2510_v62 = vadd.f32 %v603_v8, %v562_v54 }
  0xbd   : > { %v544_v7 = vsel %vm241_vm0, %v541_v48, %v543_v45  ;;  %v578_v46 = vmul.f32 %v2167_v5, %v487_v24  ;;  %v639_v59 = vmul.f32 %v2325_v60, %v487_v24  ;;  %v605_v1 = vsel %vm303_vm1, %v602_v13, %v604_v40 }
  0xbe   : > { %v563_v17 = vadd.f32 %v544_v7, %v502_v31  ;;  %v726_v63 = vrot.slane %v697_v2, 4  ;;  %v2517_v49 = vmul.f32 %v2328_v30, %v487_v24  ;;  %v496_v26 = vmul.f32 %v2336_v19, %v485_v34  ;;  %v752_v24 = vpop.permute.xlu1 %751 }
  0xbf   : > { %v516_v18 = vmul.f32 %v2142_v53, %v485_v34  ;;  %v577_v54 = vmul.f32 %v2167_v5, %v485_v34  ;;  %v638_v47 = vmul.f32 %v2325_v60, %v485_v34  ;;  %v666_v42 = vsel %vm365_vm2, %v663_v10, %v665_v41 }
  0xc0   : > { %v624_v48 = vadd.f32 %v605_v1, %v563_v17  ;;  %v548_v8 = vrot.slane %v517_v14, 1  ;;  %v2525_v31 = vmul.f32 %v2328_v30, %v485_v34  ;;  %v670_v13 = vrot.slane %v639_v59, 3 }
  0xc1   : > { %v546_v2 = vrot.slane %v516_v18, 1  ;;  %v668_v45 = vrot.slane %v638_v47, 3  ;;  %v681_v19 = vadd.f32 %v2453_v15, %v2450_v56  ;;  %v728_v53 = vrot.slane %v2507_v21, 4 }
  0xc2   : > { %v685_v40 = vadd.f32 %v666_v42, %v624_v48  ;;  %v609_v5 = vrot.slane %v578_v46, 2  ;;  %v607_v7 = vrot.slane %v577_v54, 2  ;;  %v727_v60 = vsel %vm427_vm3, %v724_v38, %v726_v63  ;;  %v750_v63 = vpop.permute.xlu0 %749 }
  0xc3   : > { %v504_v30 = vadd.f32 %v496_v26, %v2380_v52  ;;  %v3257_v14 = vrot.slane %v2373_v9, 4  ;;  %v3258_v10 = vrot.slane %v2418_v28, 4  ;;  %v547_v56 = vsel %vm241_vm0, %v545_v12, %v546_v2 }
  0xc4   : > { %v549_v15 = vsel %vm241_vm0, %v546_v2, %v548_v8  ;;  %v2543_v46 = vsel %vm365_vm2, %v667_v44, %v668_v45  ;;  %v729_v59 = vrot.slane %v2525_v31, 4  ;;  %v2547_v17 = vsel %vm365_vm2, %v668_v45, %v670_v13  ;;  %v756_v8 = vpop.permute.xlu1 %755 }
  0xc5   : > { %v717_v34 = vsel %vm427_vm3, %v3258_v10, %v3257_v14  ;;  %v775_v52 = vmul.f32 %v2350_v6, %v752_v24  ;;  %v792_v9 = vmul.f32 %v2353_v20, %v752_v24  ;;  %v2551_v26 = vadd.f32 %v727_v60, %v685_v40 }
  0xc6   : > { %v742_v1 = vadd.f32 %v717_v34, %v681_v19  ;;  %v608_v12 = vsel %vm303_vm1, %v606_v33, %v607_v7  ;;  %v610_v18 = vsel %vm303_vm1, %v607_v7, %v609_v5  ;;  %v853_v44 = vmul.f32 %v2357_v23, %v752_v24 }
  0xc7   : > { %v564_v54 = vadd.f32 %v547_v56, %v503_v39  ;;  %v565_v47 = vadd.f32 %v549_v15, %v504_v30  ;;  %v914_v48 = vmul.f32 %v2360_v43, %v752_v24  ;;  %v680_v42 = vadd.f32 %v2446_v27, %v2448_v58 }
  0xc8   : > { %v816_v13 = vrot.slane %v792_v9, 1  ;;  %v3259_v2 = vmov %v3258_v10  ;;  %v3260_v45 = vrot.slane %v2404_v22, 4  ;;  %v774_v33 = vmul.f32 %v2350_v6, %v750_v63 }
  0xc9   : > { %v791_v40 = vmul.f32 %v2353_v20, %v750_v63  ;;  %v2567_v39 = vmul.f32 %v2363_v0, %v752_v24  ;;  %v852_v7 = vmul.f32 %v2357_v23, %v750_v63  ;;  %v913_v27 = vmul.f32 %v2360_v43, %v750_v63 }
  0xca   : > { %v715_v19 = vsel %vm427_vm3, %v3260_v45, %v3259_v2  ;;  %v877_v58 = vrot.slane %v853_v44, 2  ;;  %v2572_v28 = vmul.f32 %v2363_v0, %v750_v63  ;;  %v682_v22 = vadd.f32 %v2470_v51, %v2485_v29 }
  0xcb   : > { %v741_v5 = vadd.f32 %v715_v19, %v680_v42  ;;  %v815_v60 = vrot.slane %v791_v40, 1  ;;  %v938_v30 = vrot.slane %v914_v48, 3  ;;  %v876_v10 = vrot.slane %v852_v7, 2  ;;  %v754_v42 = vpop.permute.xlu0 %753 }
  0xcc   : > { %v937_v34 = vrot.slane %v913_v27, 3  ;;  %v2576_v56 = vadd.f32 %v608_v12, %v564_v54  ;;  %v2578_v24 = vadd.f32 %v610_v18, %v565_v47  ;;  %v783_v15 = vadd.f32 %v775_v52, %v742_v1  ;;  %v760_v12 = vpop.permute.xlu1 %759 }
  0xcd   : > { %v782_v14 = vadd.f32 %v774_v33, %v741_v5  ;;  %v817_v9 = vsel %vm241_vm0, %v815_v60, %v816_v13  ;;  %v999_v44 = vrot.slane %v2567_v39, 4  ;;  %v3261_v63 = vrot.slane %v2438_v11, 4 }
  0xce   : > { %v3262_v2 = vrot.slane %v2413_v61, 4  ;;  %v776_v29 = vmul.f32 %v2350_v6, %v756_v8  ;;  %v794_v48 = vmul.f32 %v2353_v20, %v756_v8  ;;  %v855_v52 = vmul.f32 %v2357_v23, %v756_v8 }
  0xcf   : > { %v843_v54 = vadd.f32 %v817_v9, %v782_v14  ;;  %v878_v47 = vsel %vm303_vm1, %v876_v10, %v877_v58  ;;  %v2593_v45 = vsel %vm365_vm2, %v937_v34, %v938_v30  ;;  %v793_v61 = vmul.f32 %v2353_v20, %v754_v42 }
  0xd0   : > { %v720_v51 = vsel %vm427_vm3, %v3262_v2, %v3261_v63  ;;  %v854_v19 = vmul.f32 %v2357_v23, %v754_v42  ;;  %v2598_v33 = vmul.f32 %v2360_v43, %v756_v8  ;;  %v915_v40 = vmul.f32 %v2360_v43, %v754_v42  ;;  %v758_v2 = vpop.permute.xlu0 %757 }
  0xd1   : > { %v743_v1 = vadd.f32 %v720_v51, %v682_v22  ;;  %v976_v5 = vmul.f32 %v2363_v0, %v754_v42  ;;  %v796_v7 = vmul.f32 %v2353_v20, %v760_v12  ;;  %v820_v60 = vrot.slane %v794_v48, 1 }
  0xd2   : > { %v818_v22 = vrot.slane %v793_v61, 1  ;;  %v879_v14 = vrot.slane %v854_v19, 2  ;;  %v2603_v10 = vadd.f32 %v878_v47, %v843_v54  ;;  %v881_v34 = vrot.slane %v855_v52, 2  ;;  %v764_v52 = vpop.permute.xlu1 %763 }
  0xd3   : > { %v784_v27 = vadd.f32 %v776_v29, %v743_v1  ;;  %v2606_v9 = vmul.f32 %v2363_v0, %v756_v8  ;;  %v940_v63 = vrot.slane %v915_v40, 3  ;;  %v1001_v18 = vrot.slane %v976_v5, 4 }
  0xd4   : > { %v819_v51 = vsel %vm241_vm0, %v816_v13, %v818_v22  ;;  %v857_v41 = vmul.f32 %v2357_v23, %v760_v12  ;;  %v2611_v42 = vmul.f32 %v2360_v43, %v760_v12  ;;  %v880_v48 = vsel %vm303_vm1, %v877_v58, %v879_v14 }
  0xd5   : > { %v844_v29 = vadd.f32 %v819_v51, %v783_v15  ;;  %v823_v1 = vrot.slane %v796_v7, 1  ;;  %v2615_v54 = vmul.f32 %v2363_v0, %v760_v12  ;;  %v941_v8 = vsel %vm365_vm2, %v938_v30, %v940_v63 }
  0xd6   : > { %v683_v47 = vadd.f32 %v2480_v35, %v2491_v4  ;;  %v777_v13 = vmul.f32 %v2350_v6, %v758_v2  ;;  %v795_v61 = vmul.f32 %v2353_v20, %v758_v2  ;;  %v3263_v40 = vrot.slane %v2431_v32, 4 }
  0xd7   : > { %v905_v19 = vadd.f32 %v880_v48, %v844_v29  ;;  %v3264_v15 = vrot.slane %v2438_v11, 4  ;;  %v856_v12 = vmul.f32 %v2357_v23, %v758_v2  ;;  %v917_v5 = vmul.f32 %v2360_v43, %v758_v2 }
  0xd8   : > { %v821_v30 = vrot.slane %v795_v61, 1  ;;  %v2630_v22 = vmul.f32 %v2363_v0, %v758_v2  ;;  %v779_v35 = vmul.f32 %v2350_v6, %v764_v52  ;;  %v942_v4 = vrot.slane %v2598_v33, 3 }
  0xd9   : > { %v722_v58 = vsel %vm427_vm3, %v3264_v15, %v3263_v40  ;;  %v966_v14 = vadd.f32 %v941_v8, %v905_v19  ;;  %v884_v63 = vrot.slane %v857_v41, 2  ;;  %v882_v32 = vrot.slane %v856_v12, 2  ;;  %v762_v41 = vpop.permute.xlu0 %761 }
  0xda   : > { %v744_v7 = vadd.f32 %v722_v58, %v683_v47  ;;  %v945_v51 = vrot.slane %v2611_v42, 3  ;;  %v822_v48 = vsel %vm241_vm0, %v820_v60, %v821_v30  ;;  %v1002_v47 = vsel %vm427_vm3, %v999_v44, %v1001_v18 }
  0xdb   : > { %v824_v61 = vsel %vm241_vm0, %v821_v30, %v823_v1  ;;  %v2643_v33 = vmul.f32 %v2353_v20, %v764_v52  ;;  %v2645_v8 = vadd.f32 %v1002_v47, %v966_v14  ;;  %v943_v19 = vrot.slane %v917_v5, 3 }
  0xdc   : > { %v785_v29 = vadd.f32 %v777_v13, %v744_v7  ;;  %v1004_v42 = vrot.slane %v2630_v22, 4  ;;  %v787_v13 = vadd.f32 %v779_v35, %v2551_v26  ;;  %v845_v60 = vadd.f32 %v822_v48, %v784_v27  ;;  %v768_v7 = vpop.permute.xlu1 %767 }
  0xdd   : > { %v883_v40 = vsel %vm303_vm1, %v881_v34, %v882_v32  ;;  %v885_v18 = vsel %vm303_vm1, %v882_v32, %v884_v63  ;;  %v859_v15 = vmul.f32 %v2357_v23, %v764_v52  ;;  %v2653_v1 = vmul.f32 %v2360_v43, %v764_v52 }
  0xde   : > { %v846_v58 = vadd.f32 %v824_v61, %v785_v29  ;;  %v684_v12 = vadd.f32 %v2503_v50, %v2510_v62  ;;  %v778_v5 = vmul.f32 %v2350_v6, %v762_v41  ;;  %v826_v30 = vrot.slane %v2643_v33, 1 }
  0xdf   : > { %v2660_v26 = vmul.f32 %v2363_v0, %v764_v52  ;;  %v3265_v27 = vrot.slane %v2477_v25, 4  ;;  %v797_v35 = vmul.f32 %v2353_v20, %v762_v41  ;;  %v887_v14 = vrot.slane %v859_v15, 2 }
  0xe0   : > { %v858_v62 = vmul.f32 %v2357_v23, %v762_v41  ;;  %v919_v50 = vmul.f32 %v2360_v43, %v762_v41  ;;  %v2671_v29 = vmul.f32 %v2363_v0, %v762_v41  ;;  %v686_v52 = vadd.f32 %v2543_v46, %v2576_v56  ;;  %v766_v56 = vpop.permute.xlu0 %765 }
  0xe1   : > { %v725_v34 = vsel %vm427_vm3, %v3265_v27, %v724_v38  ;;  %v825_v32 = vrot.slane %v797_v35, 1  ;;  %v730_v3 = vsel %vm427_vm3, %v728_v53, %v729_v59  ;;  %v948_v25 = vrot.slane %v2653_v1, 3 }
  0xe2   : > { %v745_v63 = vadd.f32 %v725_v34, %v684_v12  ;;  %v886_v48 = vrot.slane %v858_v62, 2  ;;  %v947_v47 = vrot.slane %v919_v50, 3  ;;  %v2682_v61 = vsel %vm365_vm2, %v942_v4, %v943_v19  ;;  %v772_v12 = vpop.permute.xlu1 %771 }
  0xe3   : > { %v2685_v33 = vsel %vm365_vm2, %v943_v19, %v945_v51  ;;  %v827_v41 = vsel %vm241_vm0, %v825_v32, %v826_v30  ;;  %v747_v46 = vadd.f32 %v730_v3, %v686_v52  ;;  %v2688_v15 = vadd.f32 %v883_v40, %v845_v60 }
  0xe4   : > { %v786_v38 = vadd.f32 %v778_v5, %v745_v63  ;;  %v2690_v21 = vadd.f32 %v885_v18, %v846_v58  ;;  %v780_v53 = vmul.f32 %v2350_v6, %v768_v7  ;;  %v800_v1 = vmul.f32 %v2353_v20, %v768_v7 }
  0xe5   : > { %v1009_v5 = vrot.slane %v2660_v26, 4  ;;  %v861_v51 = vmul.f32 %v2357_v23, %v768_v7  ;;  %v888_v19 = vsel %vm303_vm1, %v886_v48, %v887_v14  ;;  %v2699_v34 = vsel %vm365_vm2, %v947_v47, %v948_v25 }
  0xe6   : > { %v847_v4 = vadd.f32 %v827_v41, %v786_v38  ;;  %v799_v60 = vmul.f32 %v2353_v20, %v766_v56  ;;  %v860_v40 = vmul.f32 %v2357_v23, %v766_v56  ;;  %v922_v18 = vmul.f32 %v2360_v43, %v768_v7  ;;  %v770_v41 = vpop.permute.xlu0 %769 }
  0xe7   : > { %v921_v58 = vmul.f32 %v2360_v43, %v766_v56  ;;  %v982_v35 = vmul.f32 %v2363_v0, %v766_v56  ;;  %v802_v63 = vmul.f32 %v2353_v20, %v772_v12  ;;  %v788_v62 = vadd.f32 %v780_v53, %v747_v46 }
  0xe8   : > { %v830_v50 = vrot.slane %v800_v1, 1  ;;  %v828_v32 = vrot.slane %v799_v60, 1  ;;  %v889_v52 = vrot.slane %v860_v40, 2  ;;  %v2707_v3 = vadd.f32 %v888_v19, %v847_v4 }
  0xe9   : > { %v891_v38 = vrot.slane %v861_v51, 2  ;;  %v2710_v48 = vmul.f32 %v2363_v0, %v768_v7  ;;  %v950_v47 = vrot.slane %v921_v58, 3  ;;  %v1011_v2 = vrot.slane %v982_v35, 4  ;;  %v1037_v51 = vpop.permute.xlu1 %1036 }
  0xea   : > { %v829_v27 = vsel %vm241_vm0, %v826_v30, %v828_v32  ;;  %v863_v11 = vmul.f32 %v2357_v23, %v772_v12  ;;  %v2715_v56 = vmul.f32 %v2360_v43, %v772_v12  ;;  %v890_v53 = vsel %vm303_vm1, %v887_v14, %v889_v52 }
  0xeb   : > { %v848_v46 = vadd.f32 %v829_v27, %v787_v13  ;;  %v833_v1 = vrot.slane %v802_v63, 1  ;;  %v2719_v4 = vmul.f32 %v2363_v0, %v772_v12  ;;  %v687_v7 = vadd.f32 %v2547_v17, %v2578_v24 }
  0xec   : > { %v3266_v19 = vrot.slane %v2517_v49, 4  ;;  %v781_v60 = vmul.f32 %v2350_v6, %v770_v41  ;;  %v801_v13 = vmul.f32 %v2353_v20, %v770_v41  ;;  %v951_v14 = vsel %vm365_vm2, %v948_v25, %v950_v47 }
  0xed   : > { %v909_v27 = vadd.f32 %v890_v53, %v848_v46  ;;  %v862_v12 = vmul.f32 %v2357_v23, %v770_v41  ;;  %v923_v40 = vmul.f32 %v2360_v43, %v770_v41  ;;  %v2734_v17 = vmul.f32 %v2363_v0, %v770_v41 }
  0xee   : > { %v732_v30 = vsel %vm427_vm3, %v729_v59, %v3266_v19  ;;  %v831_v35 = vrot.slane %v801_v13, 1  ;;  %v1060_v49 = vmul.f32 %v2383_v55, %v1037_v51  ;;  %v952_v31 = vrot.slane %v922_v18, 3  ;;  %v1035_v18 = vpop.permute.xlu0 %1034 }
  0xef   : > { %v748_v58 = vadd.f32 %v732_v30, %v687_v7  ;;  %v970_v59 = vadd.f32 %v951_v14, %v909_v27  ;;  %v894_v24 = vrot.slane %v863_v11, 2  ;;  %v892_v6 = vrot.slane %v862_v12, 2 }
  0xf0   : > { %v1013_v20 = vrot.slane %v2710_v48, 4  ;;  %v955_v63 = vrot.slane %v2715_v56, 3  ;;  %v832_v23 = vsel %vm241_vm0, %v830_v50, %v831_v35  ;;  %v1012_v43 = vsel %vm427_vm3, %v1009_v5, %v1011_v2 }
  0xf1   : > { %v789_v25 = vadd.f32 %v781_v60, %v748_v58  ;;  %v834_v0 = vsel %vm241_vm0, %v831_v35, %v833_v1  ;;  %v953_v32 = vrot.slane %v923_v40, 3  ;;  %v2745_v52 = vmul.f32 %v2386_v36, %v1037_v51  ;;  %v1041_v60 = vpop.permute.xlu1 %1040 }
  0xf2   : > { %v2747_v11 = vadd.f32 %v1012_v43, %v970_v59  ;;  %v1016_v47 = vrot.slane %v2719_v4, 4  ;;  %v1014_v41 = vrot.slane %v2734_v17, 4  ;;  %v1068_v56 = vadd.f32 %v1060_v49, %v2645_v8 }
  0xf3   : > { %v849_v50 = vadd.f32 %v832_v23, %v788_v62  ;;  %v893_v46 = vsel %vm303_vm1, %v891_v38, %v892_v6  ;;  %v895_v2 = vsel %vm303_vm1, %v892_v6, %v894_v24  ;;  %v1138_v53 = vmul.f32 %v2389_v57, %v1037_v51 }
  0xf4   : > { %v850_v1 = vadd.f32 %v834_v0, %v789_v25  ;;  %v1199_v7 = vmul.f32 %v2393_v16, %v1037_v51  ;;  %v965_v19 = vadd.f32 %v2593_v45, %v2603_v10  ;;  %v1059_v30 = vmul.f32 %v2383_v55, %v1035_v18  ;;  %v1039_v25 = vpop.permute.xlu0 %1038 }
  0xf5   : > { %v2760_v13 = vsel %vm365_vm2, %v952_v31, %v953_v32  ;;  %v1101_v8 = vrot.slane %v2745_v52, 1  ;;  %v3267_v62 = vrot.slane %v2572_v28, 4  ;;  %v1076_v27 = vmul.f32 %v2386_v36, %v1035_v18  ;;  %v1045_v52 = vpop.permute.xlu1 %1044 }
  0xf6   : > { %v2770_v14 = vmul.f32 %v2396_v37, %v1037_v51  ;;  %v1137_v10 = vmul.f32 %v2389_v57, %v1035_v18  ;;  %v1198_v12 = vmul.f32 %v2393_v16, %v1035_v18  ;;  %v1162_v40 = vrot.slane %v1138_v53, 2 }
  0xf7   : > { %v1000_v38 = vsel %vm427_vm3, %v3267_v62, %v999_v44  ;;  %v1100_v58 = vrot.slane %v1076_v27, 1  ;;  %v2775_v35 = vmul.f32 %v2396_v37, %v1035_v18  ;;  %v967_v39 = vadd.f32 %v2682_v61, %v2688_v15 }
  0xf8   : > { %v1026_v45 = vadd.f32 %v1000_v38, %v965_v19  ;;  %v1223_v28 = vrot.slane %v1199_v7, 3  ;;  %v1161_v49 = vrot.slane %v1137_v10, 2  ;;  %v1222_v31 = vrot.slane %v1198_v12, 3 }
  0xf9   : > { %v2779_v59 = vadd.f32 %v893_v46, %v849_v50  ;;  %v2781_v51 = vadd.f32 %v895_v2, %v850_v1  ;;  %v2784_v24 = vsel %vm365_vm2, %v953_v32, %v955_v63  ;;  %v1102_v6 = vsel %vm241_vm0, %v1100_v58, %v1101_v8 }
  0xfa   : > { %v1067_v44 = vadd.f32 %v1059_v30, %v1026_v45  ;;  %v1284_v23 = vrot.slane %v2770_v14, 4  ;;  %v3268_v61 = vrot.slane %v2606_v9, 4  ;;  %v1061_v43 = vmul.f32 %v2383_v55, %v1041_v60 }
  0xfb   : > { %v1079_v0 = vmul.f32 %v2386_v36, %v1041_v60  ;;  %v1283_v63 = vrot.slane %v2775_v35, 4  ;;  %v1140_v50 = vmul.f32 %v2389_v57, %v1041_v60  ;;  %v1163_v46 = vsel %vm303_vm1, %v1161_v49, %v1162_v40 }
  0xfc   : > { %v1005_v15 = vsel %vm427_vm3, %v3268_v61, %v1004_v42  ;;  %v1128_v18 = vadd.f32 %v1102_v6, %v1067_v44  ;;  %v2799_v2 = vsel %vm365_vm2, %v1222_v31, %v1223_v28  ;;  %v1078_v9 = vmul.f32 %v2386_v36, %v1039_v25  ;;  %v1043_v44 = vpop.permute.xlu0 %1042 }
  0xfd   : > { %v1028_v32 = vadd.f32 %v1005_v15, %v967_v39  ;;  %v1139_v53 = vmul.f32 %v2389_v57, %v1039_v25  ;;  %v2804_v1 = vmul.f32 %v2393_v16, %v1041_v60  ;;  %v1200_v7 = vmul.f32 %v2393_v16, %v1039_v25 }
  0xfe   : > { %v1261_v19 = vmul.f32 %v2396_v37, %v1039_v25  ;;  %v1081_v30 = vmul.f32 %v2386_v36, %v1045_v52  ;;  %v1105_v38 = vrot.slane %v1079_v0, 1  ;;  %v1103_v27 = vrot.slane %v1078_v9, 1 }
  0xff   : > { %v1069_v62 = vadd.f32 %v1061_v43, %v1028_v32  ;;  %v1164_v45 = vrot.slane %v1139_v53, 2  ;;  %v2809_v10 = vadd.f32 %v1163_v46, %v1128_v18  ;;  %v1166_v12 = vrot.slane %v1140_v50, 2  ;;  %v1049_v18 = vpop.permute.xlu1 %1048 }
 0x100   : > { %v2812_v58 = vmul.f32 %v2396_v37, %v1041_v60  ;;  %v1225_v39 = vrot.slane %v1200_v7, 3  ;;  %v1104_v49 = vsel %vm241_vm0, %v1101_v8, %v1103_v27  ;;  %v1286_v31 = vrot.slane %v1261_v19, 4 }
 0x101   : > { %v1142_v6 = vmul.f32 %v2389_v57, %v1045_v52  ;;  %v1203_v25 = vmul.f32 %v2393_v16, %v1045_v52  ;;  %v1129_v61 = vadd.f32 %v1104_v49, %v1068_v56  ;;  %v1165_v15 = vsel %vm303_vm1, %v1162_v40, %v1164_v45 }
 0x102   : > { %v1108_v43 = vrot.slane %v1081_v30, 1  ;;  %v2819_v0 = vmul.f32 %v2396_v37, %v1045_v52  ;;  %v1226_v60 = vsel %vm365_vm2, %v1223_v28, %v1225_v39  ;;  %v968_v32 = vadd.f32 %v2685_v33, %v2690_v21 }
 0x103   : > { %v1062_v8 = vmul.f32 %v2383_v55, %v1043_v44  ;;  %v1080_v50 = vmul.f32 %v2386_v36, %v1043_v44  ;;  %v1190_v46 = vadd.f32 %v1165_v15, %v1129_v61  ;;  %v3269_v9 = vrot.slane %v2615_v54, 4  ;;  %v1047_v61 = vpop.permute.xlu0 %1046 }
 0x104   : > { %v1141_v40 = vmul.f32 %v2389_v57, %v1043_v44  ;;  %v1202_v52 = vmul.f32 %v2393_v16, %v1043_v44  ;;  %v2834_v7 = vmul.f32 %v2396_v37, %v1043_v44  ;;  %v1064_v33 = vmul.f32 %v2383_v55, %v1049_v18 }
 0x105   : > { %v1007_v56 = vsel %vm427_vm3, %v1004_v42, %v3269_v9  ;;  %v1106_v28 = vrot.slane %v1080_v50, 1  ;;  %v1227_v21 = vrot.slane %v2804_v1, 3  ;;  %v1251_v19 = vadd.f32 %v1226_v60, %v1190_v46 }
 0x106   : > { %v1029_v53 = vadd.f32 %v1007_v56, %v968_v32  ;;  %v1169_v30 = vrot.slane %v1142_v6, 2  ;;  %v1167_v54 = vrot.slane %v1141_v40, 2  ;;  %v2841_v45 = vmul.f32 %v2386_v36, %v1049_v18  ;;  %v1053_v56 = vpop.permute.xlu1 %1052 }
 0x107   : > { %v1107_v22 = vsel %vm241_vm0, %v1105_v38, %v1106_v28  ;;  %v1109_v42 = vsel %vm241_vm0, %v1106_v28, %v1108_v43  ;;  %v1288_v39 = vrot.slane %v2812_v58, 4  ;;  %v1287_v44 = vsel %vm427_vm3, %v1284_v23, %v1286_v31 }
 0x108   : > { %v1070_v27 = vadd.f32 %v1062_v8, %v1029_v53  ;;  %v1230_v49 = vrot.slane %v1203_v25, 3  ;;  %v1291_v1 = vrot.slane %v2819_v0, 4  ;;  %v2848_v6 = vadd.f32 %v1287_v44, %v1251_v19 }
 0x109   : > { %v1228_v15 = vrot.slane %v1202_v52, 3  ;;  %v1289_v38 = vrot.slane %v2834_v7, 4  ;;  %v2852_v43 = vadd.f32 %v1064_v33, %v2747_v11  ;;  %v1130_v60 = vadd.f32 %v1107_v22, %v1069_v62 }
 0x10a   : > { %v1131_v32 = vadd.f32 %v1109_v42, %v1070_v27  ;;  %v1168_v8 = vsel %vm303_vm1, %v1166_v12, %v1167_v54  ;;  %v1170_v50 = vsel %vm303_vm1, %v1167_v54, %v1169_v30  ;;  %v1111_v31 = vrot.slane %v2841_v45, 1  ;;  %v1051_v45 = vpop.permute.xlu0 %1050 }
 0x10b   : > { %v2858_v25 = vmul.f32 %v2389_v57, %v1049_v18  ;;  %v969_v46 = vadd.f32 %v2699_v34, %v2707_v3  ;;  %v1063_v9 = vmul.f32 %v2383_v55, %v1047_v61  ;;  %v2864_v11 = vmul.f32 %v2393_v16, %v1049_v18 }
 0x10c   : > { %v2867_v62 = vmul.f32 %v2396_v37, %v1049_v18  ;;  %v3270_v12 = vrot.slane %v2671_v29, 4  ;;  %v1082_v52 = vmul.f32 %v2386_v36, %v1047_v61  ;;  %v1143_v34 = vmul.f32 %v2389_v57, %v1047_v61 }
 0x10d   : > { %v1204_v3 = vmul.f32 %v2393_v16, %v1047_v61  ;;  %v2878_v28 = vmul.f32 %v2396_v37, %v1047_v61  ;;  %v2880_v33 = vadd.f32 %v1168_v8, %v1130_v60  ;;  %v2883_v18 = vsel %vm365_vm2, %v1227_v21, %v1228_v15 }
 0x10e   : > { %v1010_v40 = vsel %vm427_vm3, %v3270_v12, %v1009_v5  ;;  %v2886_v26 = vsel %vm365_vm2, %v1228_v15, %v1230_v49  ;;  %v1110_v29 = vrot.slane %v1082_v52, 1  ;;  %v2888_v5 = vadd.f32 %v1170_v50, %v1131_v32 }
 0x10f   : > { %v1030_v53 = vadd.f32 %v1010_v40, %v969_v46  ;;  %v1172_v19 = vrot.slane %v2858_v25, 2  ;;  %v971_v54 = vadd.f32 %v2760_v13, %v2779_v59  ;;  %v1233_v27 = vrot.slane %v2864_v11, 3  ;;  %v1057_v13 = vpop.permute.xlu1 %1056 }
 0x110   : > { %v3253_v22 = vrot.slane %v2867_v62, 4  ;;  %v1112_v42 = vsel %vm241_vm0, %v1110_v29, %v1111_v31  ;;  %v1171_v21 = vrot.slane %v1143_v34, 2  ;;  %v1232_v44 = vrot.slane %v1204_v3, 3 }
 0x111   : > { %v1071_v30 = vadd.f32 %v1063_v9, %v1030_v53  ;;  %v1015_v61 = vsel %vm427_vm3, %v1013_v20, %v1014_v41  ;;  %v1065_v15 = vmul.f32 %v2383_v55, %v1053_v56  ;;  %v1085_v60 = vmul.f32 %v2386_v36, %v1053_v56 }
 0x112   : > { %v2905_v32 = vmul.f32 %v2389_v57, %v1053_v56  ;;  %v2908_v8 = vmul.f32 %v2393_v16, %v1053_v56  ;;  %v1032_v50 = vadd.f32 %v1015_v61, %v971_v54  ;;  %v2911_v25 = vmul.f32 %v2396_v37, %v1053_v56  ;;  %v1055_v54 = vpop.permute.xlu0 %1054 }
 0x113   : > { %v1132_v59 = vadd.f32 %v1112_v42, %v1071_v30  ;;  %v1084_v48 = vmul.f32 %v2386_v36, %v1051_v45  ;;  %v1145_v20 = vmul.f32 %v2389_v57, %v1051_v45  ;;  %v1173_v46 = vsel %vm303_vm1, %v1171_v21, %v1172_v19 }
 0x114   : > { %v1206_v9 = vmul.f32 %v2393_v16, %v1051_v45  ;;  %v1267_v11 = vmul.f32 %v2396_v37, %v1051_v45  ;;  %v1087_v12 = vmul.f32 %v2386_v36, %v1057_v13  ;;  %v2920_v40 = vsel %vm365_vm2, %v1232_v44, %v1233_v27 }
 0x115   : > { %v1073_v52 = vadd.f32 %v1065_v15, %v1032_v50  ;;  %v1113_v53 = vrot.slane %v1084_v48, 1  ;;  %v1174_v34 = vrot.slane %v1145_v20, 2  ;;  %v2926_v56 = vadd.f32 %v1173_v46, %v1132_v59 }
 0x116   : > { %v1115_v3 = vrot.slane %v1085_v60, 1  ;;  %v1176_v29 = vrot.slane %v2905_v32, 2  ;;  %v1237_v30 = vrot.slane %v2908_v8, 3  ;;  %v2935_v45 = vmul.f32 %v2389_v57, %v1057_v13 }
 0x117   : > { %v1114_v21 = vsel %vm241_vm0, %v1111_v31, %v1113_v53  ;;  %v2938_v44 = vmul.f32 %v2393_v16, %v1057_v13  ;;  %v1235_v15 = vrot.slane %v1206_v9, 3  ;;  %v1296_v59 = vrot.slane %v1267_v11, 4  ;;  %v1322_v9 = vpop.permute.xlu1 %1321 }
 0x118   : > { %v1133_v61 = vadd.f32 %v1114_v21, %v2852_v43  ;;  %v1118_v60 = vrot.slane %v1087_v12, 1  ;;  %v1175_v32 = vsel %vm303_vm1, %v1172_v19, %v1174_v34  ;;  %v2947_v8 = vmul.f32 %v2396_v37, %v1057_v13  ;;  %v1320_v21 = vpop.permute.xlu0 %1319 }
 0x119   : > { %v972_v31 = vadd.f32 %v2784_v24, %v2781_v51  ;;  %v1086_v50 = vmul.f32 %v2386_v36, %v1055_v54  ;;  %v2953_v20 = vmul.f32 %v2389_v57, %v1055_v54  ;;  %v2956_v43 = vmul.f32 %v2393_v16, %v1055_v54 }
 0x11a   : > { %v1194_v48 = vadd.f32 %v1175_v32, %v1133_v61  ;;  %v2959_v46 = vmul.f32 %v2396_v37, %v1055_v54  ;;  %v1017_v36 = vsel %vm427_vm3, %v1014_v41, %v1016_v47  ;;  %v1066_v51 = vmul.f32 %v2383_v55, %v1055_v54 }
 0x11b   : > { %v1116_v24 = vrot.slane %v1086_v50, 1  ;;  %v1236_v57 = vsel %vm365_vm2, %v1233_v27, %v1235_v15  ;;  %v1033_v37 = vadd.f32 %v1017_v36, %v972_v31  ;;  %v3252_v13 = vrot.slane %v2953_v20, 2 }
 0x11c   : > { %v3251_v17 = vrot.slane %v2956_v43, 3  ;;  %v2974_v11 = vstv %s2922_s14  ;;  %v2977_v47 = vstv %s2924_s16  ;;  %v2979_v55 = vadd.f32 %v1236_v57, %v1194_v48 }
 0x11d   : > { %v1117_v4 = vsel %vm241_vm0, %v1115_v3, %v1116_v24  ;;  %v2984_v41 = vsel %vm427_vm3, %v3253_v22, %v1296_v59  ;;  %v2988_v12 = vstv %s2930_s17  ;;  %v2990_v53 = vadd.f32 %v1066_v51, %v1033_v37  ;;  %v1326_v51 = vpop.permute.xlu1 %1325 }
 0x11e   : > { %v2993_v34 = vsel %vm241_vm0, %v1116_v24, %v1118_v60  ;;  %v2996_v3 = vstv %s2940_s21  ;;  %v2999_v54 = vstv %s2942_s22  ;;  %v1134_v61 = vadd.f32 %v1117_v4, %v1073_v52 }
 0x11f   : > { %v1178_v15 = vsel %vm303_vm1, %v1176_v29, %v3252_v13  ;;  %v3005_v59 = vmul.f32 %v2974_v11, %v1322_v9  ;;  %v3008_v32 = vmul.f32 %v2977_v47, %v1322_v9  ;;  %v3013_v60 = vsel %vm365_vm2, %v1237_v30, %v3251_v17 }
 0x120   : > { %v3016_v31 = vmul.f32 %v2996_v3, %v1322_v9  ;;  %v3019_v52 = vmul.f32 %v2999_v54, %v1322_v9  ;;  %v1250_v29 = vadd.f32 %v2799_v2, %v2809_v10  ;;  %v1345_v50 = vmul.f32 %v2988_v12, %v1322_v9 }
 0x121   : > { %v1386_v48 = vrot.slane %v3005_v59, 1  ;;  %v1285_v30 = vsel %vm427_vm3, %v1283_v63, %v1284_v23  ;;  %v1344_v36 = vmul.f32 %v2988_v12, %v1320_v21  ;;  %v1447_v24 = vrot.slane %v3008_v32, 2 }
 0x122   : > { %v1508_v57 = vrot.slane %v3016_v31, 3  ;;  %v1311_v37 = vadd.f32 %v1285_v30, %v1250_v29  ;;  %v1361_v2 = vmul.f32 %v2974_v11, %v1320_v21  ;;  %v1422_v10 = vmul.f32 %v2977_v47, %v1320_v21 }
 0x123   : > { %v1483_v9 = vmul.f32 %v2996_v3, %v1320_v21  ;;  %v1544_v14 = vmul.f32 %v2999_v54, %v1320_v21  ;;  %v1252_v35 = vadd.f32 %v2883_v18, %v2880_v33  ;;  %v1569_v23 = vrot.slane %v3019_v52, 4 }
 0x124   : > { %v1352_v63 = vadd.f32 %v1344_v36, %v1311_v37  ;;  %v1385_v4 = vrot.slane %v1361_v2, 1  ;;  %v1346_v59 = vmul.f32 %v2988_v12, %v1326_v51  ;;  %v1446_v32 = vrot.slane %v1422_v10, 2  ;;  %v1324_v36 = vpop.permute.xlu0 %1323 }
 0x125   : > { %v1507_v31 = vrot.slane %v1483_v9, 3  ;;  %v1568_v29 = vrot.slane %v1544_v14, 4  ;;  %v1290_v30 = vsel %vm427_vm3, %v1288_v39, %v1289_v38  ;;  %v3046_v21 = vadd.f32 %v1178_v15, %v1134_v61  ;;  %v1330_v39 = vpop.permute.xlu1 %1329 }
 0x126   : > { %v1353_v33 = vadd.f32 %v1345_v50, %v2848_v6  ;;  %v1387_v18 = vsel %vm241_vm0, %v1385_v4, %v1386_v48  ;;  %v1313_v52 = vadd.f32 %v1290_v30, %v1252_v35  ;;  %v1364_v2 = vmul.f32 %v2974_v11, %v1326_v51 }
 0x127   : > { %v1413_v37 = vadd.f32 %v1387_v18, %v1352_v63  ;;  %v3053_v10 = vmul.f32 %v2977_v47, %v1326_v51  ;;  %v3056_v58 = vmul.f32 %v2996_v3, %v1326_v51  ;;  %v1448_v61 = vsel %vm303_vm1, %v1446_v32, %v1447_v24 }
 0x128   : > { %v1509_v15 = vsel %vm365_vm2, %v1507_v31, %v1508_v57  ;;  %v1570_v6 = vsel %vm427_vm3, %v1568_v29, %v1569_v23  ;;  %v1354_v50 = vadd.f32 %v1346_v59, %v1313_v52  ;;  %v1547_v14 = vmul.f32 %v2999_v54, %v1326_v51  ;;  %v1328_v16 = vpop.permute.xlu0 %1327 }
 0x129   : > { %v1474_v9 = vadd.f32 %v1448_v61, %v1413_v37  ;;  %v1363_v35 = vmul.f32 %v2974_v11, %v1324_v36  ;;  %v1424_v63 = vmul.f32 %v2977_v47, %v1324_v36  ;;  %v1485_v4 = vmul.f32 %v2996_v3, %v1324_v36 }
 0x12a   : > { %v1546_v30 = vmul.f32 %v2999_v54, %v1324_v36  ;;  %v1366_v32 = vmul.f32 %v2974_v11, %v1330_v39  ;;  %v1427_v31 = vmul.f32 %v2977_v47, %v1330_v39  ;;  %v1390_v29 = vrot.slane %v1364_v2, 1 }
 0x12b   : > { %v1535_v18 = vadd.f32 %v1509_v15, %v1474_v9  ;;  %v1388_v59 = vrot.slane %v1363_v35, 1  ;;  %v1449_v52 = vrot.slane %v1424_v63, 2  ;;  %v1451_v37 = vrot.slane %v3053_v10, 2 }
 0x12c   : > { %v1512_v51 = vrot.slane %v3056_v58, 3  ;;  %v1573_v61 = vrot.slane %v1547_v14, 4  ;;  %v1510_v17 = vrot.slane %v1485_v4, 3  ;;  %v1571_v13 = vrot.slane %v1546_v30, 4 }
 0x12d   : > { %v1596_v42 = vadd.f32 %v1570_v6, %v1535_v18  ;;  %v1389_v27 = vsel %vm241_vm0, %v1386_v48, %v1388_v59  ;;  %v1393_v36 = vrot.slane %v1366_v32, 1  ;;  %v1450_v49 = vsel %vm303_vm1, %v1447_v24, %v1449_v52  ;;  %v1332_v32 = vpop.permute.xlu0 %1331 }
 0x12e   : > { %v1414_v19 = vadd.f32 %v1389_v27, %v1353_v33  ;;  %v1454_v22 = vrot.slane %v1427_v31, 2  ;;  %v1488_v2 = vmul.f32 %v2996_v3, %v1330_v39  ;;  %v1511_v10 = vsel %vm365_vm2, %v1508_v57, %v1510_v17 }
 0x12f   : > { %1604 = vst [vmem:[%s3075_s25] sm:$0xff] %v1596_v42  ;;  %v1549_v58 = vmul.f32 %v2999_v54, %v1330_v39  ;;  %v1253_v15 = vadd.f32 %v2886_v26, %v2888_v5  ;;  %v1347_v48 = vmul.f32 %v2988_v12, %v1328_v16  ;;  %v1292_v27 = vsel %vm427_vm3, %v1289_v38, %v1291_v1  ;;  %v1334_v5 = vpop.permute.xlu1 %1333 }
 0x130   : > { %v1475_v6 = vadd.f32 %v1450_v49, %v1414_v19  ;;  %v1365_v24 = vmul.f32 %v2974_v11, %v1328_v16  ;;  %v1426_v42 = vmul.f32 %v2977_v47, %v1328_v16  ;;  %v1572_v17 = vsel %vm427_vm3, %v1569_v23, %v1571_v13 }
 0x131   : > { %v1314_v57 = vadd.f32 %v1292_v27, %v1253_v15  ;;  %v1487_v33 = vmul.f32 %v2996_v3, %v1328_v16  ;;  %v1548_v26 = vmul.f32 %v2999_v54, %v1328_v16  ;;  %v1515_v49 = vrot.slane %v1488_v2, 3 }
 0x132   : > { %v1536_v39 = vadd.f32 %v1511_v10, %v1475_v6  ;;  %v1391_v0 = vrot.slane %v1365_v24, 1  ;;  %v1452_v19 = vrot.slane %v1426_v42, 2  ;;  %v1576_v7 = vrot.slane %v1549_v58, 4 }
 0x133   : > { %v1355_v9 = vadd.f32 %v1347_v48, %v1314_v57  ;;  %v1513_v1 = vrot.slane %v1487_v33, 3  ;;  %v1574_v38 = vrot.slane %v1548_v26, 4  ;;  %v3096_v23 = vmul.f32 %v2974_v11, %v1334_v5 }
 0x134   : > { %v1597_v14 = vadd.f32 %v1572_v17, %v1536_v39  ;;  %v1392_v35 = vsel %vm241_vm0, %v1390_v29, %v1391_v0  ;;  %v1394_v13 = vsel %vm241_vm0, %v1391_v0, %v1393_v36  ;;  %v1453_v4 = vsel %vm303_vm1, %v1451_v37, %v1452_v19  ;;  %v1338_v17 = vpop.permute.xlu1 %1337 }
 0x135   : > { %v1415_v63 = vadd.f32 %v1392_v35, %v1354_v50  ;;  %v1416_v16 = vadd.f32 %v1394_v13, %v1355_v9  ;;  %v1349_v30 = vmul.f32 %v2988_v12, %v1334_v5  ;;  %v1455_v31 = vsel %vm303_vm1, %v1452_v19, %v1454_v22  ;;  %v1336_v13 = vpop.permute.xlu0 %1335 }
 0x136   : > { %1605 = vst [vmem:[%s3075_s25 + $0x8] sm:$0xff] %v1597_v14  ;;  %v1514_v18 = vsel %vm365_vm2, %v1512_v51, %v1513_v1  ;;  %v1516_v59 = vsel %vm365_vm2, %v1513_v1, %v1515_v49  ;;  %v1575_v29 = vsel %vm427_vm3, %v1573_v61, %v1574_v38  ;;  %v1577_v2 = vsel %vm427_vm3, %v1574_v38, %v1576_v7 }
 0x137   : > { %v1476_v52 = vadd.f32 %v1453_v4, %v1415_v63  ;;  %v1477_v36 = vadd.f32 %v1455_v31, %v1416_v16  ;;  %v3107_v50 = vmul.f32 %v2977_v47, %v1334_v5  ;;  %v1396_v37 = vrot.slane %v3096_v23, 1 }
 0x138   : > { %v3111_v10 = vmul.f32 %v2996_v3, %v1334_v5  ;;  %v1254_v22 = vadd.f32 %v2920_v40, %v2926_v56  ;;  %v1348_v51 = vmul.f32 %v2988_v12, %v1332_v32  ;;  %v3117_v61 = vmul.f32 %v2999_v54, %v1334_v5  ;;  %v1342_v31 = vpop.permute.xlu1 %1341 }
 0x139   : > { %v1537_v58 = vadd.f32 %v1514_v18, %v1476_v52  ;;  %v1538_v15 = vadd.f32 %v1516_v59, %v1477_v36  ;;  %v3271_v48 = vrot.slane %v2867_v62, 4  ;;  %v3272_v6 = vrot.slane %v2878_v28, 4 }
 0x13a   : > { %v1457_v24 = vrot.slane %v3107_v50, 2  ;;  %v1367_v40 = vmul.f32 %v2974_v11, %v1332_v32  ;;  %v1428_v56 = vmul.f32 %v2977_v47, %v1332_v32  ;;  %v1489_v26 = vmul.f32 %v2996_v3, %v1332_v32 }
 0x13b   : > { %v1295_v27 = vsel %vm427_vm3, %v3272_v6, %v3271_v48  ;;  %v1598_v57 = vadd.f32 %v1575_v29, %v1537_v58  ;;  %v1599_v33 = vadd.f32 %v1577_v2, %v1538_v15  ;;  %v1550_v62 = vmul.f32 %v2999_v54, %v1332_v32 }
 0x13c   : > { %v1315_v42 = vadd.f32 %v1295_v27, %v1254_v22  ;;  %v1395_v28 = vrot.slane %v1367_v40, 1  ;;  %v1456_v39 = vrot.slane %v1428_v56, 2  ;;  %v1256_v49 = vadd.f32 %v3013_v60, %v3046_v21 }
 0x13d   : > { %v1316_v0 = vadd.f32 %v2984_v41, %v2979_v55  ;;  %v1301_v19 = vrot.slane %v2947_v8, 4  ;;  %1606 = vst [vmem:[%s3075_s25 + $0x10] sm:$0xff] %v1598_v57  ;;  %1607 = vst [vmem:[%s3075_s25 + $0x18] sm:$0xff] %v1599_v33  ;;  %v1518_v7 = vrot.slane %v3111_v10, 3  ;;  %v1517_v9 = vrot.slane %v1489_v26, 3 }
 0x13e   : > { %v1356_v5 = vadd.f32 %v1348_v51, %v1315_v42  ;;  %v3273_v1 = vrot.slane %v2935_v45, 2  ;;  %v3274_v38 = vrot.slane %v2953_v20, 2  ;;  %v1579_v35 = vrot.slane %v3117_v61, 4  ;;  %v1340_v42 = vpop.permute.xlu0 %1339 }
 0x13f   : > { %v1397_v60 = vsel %vm241_vm0, %v1395_v28, %v1396_v37  ;;  %v1578_v21 = vrot.slane %v1550_v62, 4  ;;  %v1135_v8 = vadd.f32 %v2993_v34, %v2990_v53  ;;  %v1357_v55 = vadd.f32 %v1349_v30, %v1316_v0 }
 0x140   : > { %v1180_v14 = vsel %vm303_vm1, %v3274_v38, %v3273_v1  ;;  %v1417_v41 = vadd.f32 %v1397_v60, %v1356_v5  ;;  %v3275_v23 = vrot.slane %v2959_v46, 4  ;;  %v3276_v63 = vrot.slane %v2911_v25, 4 }
 0x141   : > { %v1458_v20 = vsel %vm303_vm1, %v1456_v39, %v1457_v24  ;;  %v1350_v4 = vmul.f32 %v2988_v12, %v1338_v17  ;;  %v1370_v32 = vmul.f32 %v2974_v11, %v1338_v17  ;;  %v1519_v59 = vsel %vm365_vm2, %v1517_v9, %v1518_v7 }
 0x142   : > { %v1300_v45 = vsel %vm427_vm3, %v3276_v63, %v3275_v23  ;;  %v1478_v18 = vadd.f32 %v1458_v20, %v1417_v41  ;;  %v1369_v53 = vmul.f32 %v2974_v11, %v1336_v13  ;;  %v1430_v34 = vmul.f32 %v2977_v47, %v1336_v13 }
 0x143   : > { %v1317_v16 = vadd.f32 %v1300_v45, %v1256_v49  ;;  %v1580_v30 = vsel %vm427_vm3, %v1578_v21, %v1579_v35  ;;  %v1431_v25 = vmul.f32 %v2977_v47, %v1338_v17  ;;  %v1491_v29 = vmul.f32 %v2996_v3, %v1336_v13 }
 0x144   : > { %v1552_v52 = vmul.f32 %v2999_v54, %v1336_v13  ;;  %v1539_v36 = vadd.f32 %v1519_v59, %v1478_v18  ;;  %v1398_v2 = vrot.slane %v1369_v53, 1  ;;  %v1459_v50 = vrot.slane %v1430_v34, 2 }
 0x145   : > { %v1372_v10 = vmul.f32 %v2974_v11, %v1342_v31  ;;  %v1358_v22 = vadd.f32 %v1350_v4, %v1317_v16  ;;  %v1400_v51 = vrot.slane %v1370_v32, 1  ;;  %v1520_v58 = vrot.slane %v1491_v29, 3 }
 0x146   : > { %v1581_v15 = vrot.slane %v1552_v52, 4  ;;  %v1600_v61 = vadd.f32 %v1580_v30, %v1539_v36  ;;  %v1492_v48 = vmul.f32 %v2996_v3, %v1338_v17  ;;  %v1553_v6 = vmul.f32 %v2999_v54, %v1338_v17 }
 0x147   : > { %v1399_v27 = vsel %vm241_vm0, %v1396_v37, %v1398_v2  ;;  %v1461_v40 = vrot.slane %v1431_v25, 2  ;;  %v1433_v57 = vmul.f32 %v2977_v47, %v1342_v31  ;;  %v1494_v33 = vmul.f32 %v2996_v3, %v1342_v31 }
 0x148   : > { %v1418_v56 = vadd.f32 %v1399_v27, %v1357_v55  ;;  %1608 = vst [vmem:[%s3075_s25 + $0x20] sm:$0xff] %v1600_v61  ;;  %v1460_v26 = vsel %vm303_vm1, %v1457_v24, %v1459_v50  ;;  %v1521_v62 = vsel %vm365_vm2, %v1518_v7, %v1520_v58  ;;  %v1403_v5 = vrot.slane %v1372_v10, 1 }
 0x149   : > { %v1196_v28 = vadd.f32 %v1180_v14, %v1135_v8  ;;  %v1582_v49 = vsel %vm427_vm3, %v1579_v35, %v1581_v15  ;;  %v3277_v17 = vrot.slane %v2938_v44, 3  ;;  %v3278_v37 = vrot.slane %v2956_v43, 3 }
 0x14a   : > { %v1479_v39 = vadd.f32 %v1460_v26, %v1418_v56  ;;  %v1371_v9 = vmul.f32 %v2974_v11, %v1340_v42  ;;  %v1351_v38 = vmul.f32 %v2988_v12, %v1340_v42  ;;  %v1432_v24 = vmul.f32 %v2977_v47, %v1340_v42 }
 0x14b   : > { %v1241_v0 = vsel %vm365_vm2, %v3278_v37, %v3277_v17  ;;  %v1493_v7 = vmul.f32 %v2996_v3, %v1340_v42  ;;  %v3279_v60 = vmov %v3275_v23  ;;  %v1554_v43 = vmul.f32 %v2999_v54, %v1340_v42 }
 0x14c   : > { %v1257_v1 = vadd.f32 %v1241_v0, %v1196_v28  ;;  %v1540_v14 = vadd.f32 %v1521_v62, %v1479_v39  ;;  %v1302_v35 = vsel %vm427_vm3, %v3279_v60, %v1301_v19  ;;  %v1401_v44 = vrot.slane %v1371_v9, 1 }
 0x14d   : > { %v1464_v21 = vrot.slane %v1433_v57, 2  ;;  %v1555_v13 = vmul.f32 %v2999_v54, %v1342_v31  ;;  %v1462_v8 = vrot.slane %v1432_v24, 2  ;;  %v1523_v3 = vrot.slane %v1493_v7, 3 }
 0x14e   : > { %v1318_v11 = vadd.f32 %v1302_v35, %v1257_v1  ;;  %v1601_v55 = vadd.f32 %v1582_v49, %v1540_v14  ;;  %v1402_v12 = vsel %vm241_vm0, %v1400_v51, %v1401_v44  ;;  %v1404_v47 = vsel %vm241_vm0, %v1401_v44, %v1403_v5 }
 0x14f   : > { %v1419_v46 = vadd.f32 %v1402_v12, %v1358_v22  ;;  %v1522_v23 = vrot.slane %v1492_v48, 3  ;;  %v1525_v19 = vrot.slane %v1494_v33, 3  ;;  %v1463_v63 = vsel %vm303_vm1, %v1461_v40, %v1462_v8 }
 0x150   : > { %v1359_v41 = vadd.f32 %v1351_v38, %v1318_v11  ;;  %1609 = vst [vmem:[%s3075_s25 + $0x28] sm:$0xff] %v1601_v55  ;;  %v1584_v45 = vrot.slane %v1554_v43, 4  ;;  %v1583_v16 = vrot.slane %v1553_v6, 4  ;;  %v1586_v4 = vrot.slane %v1555_v13, 4 }
 0x151   : > { %v1480_v54 = vadd.f32 %v1463_v63, %v1419_v46  ;;  %v1465_v32 = vsel %vm303_vm1, %v1462_v8, %v1464_v21  ;;  %v1524_v31 = vsel %vm365_vm2, %v1522_v23, %v1523_v3  ;;  %v1526_v53 = vsel %vm365_vm2, %v1523_v3, %v1525_v19 }
 0x152   : > { %v1420_v20 = vadd.f32 %v1404_v47, %v1359_v41  ;;  %v1585_v34 = vsel %vm427_vm3, %v1583_v16, %v1584_v45  ;;  %v1587_v29 = vsel %vm427_vm3, %v1584_v45, %v1586_v4 }
 0x153   : > { %v1541_v59 = vadd.f32 %v1524_v31, %v1480_v54 }
 0x154   : > { %v1481_v18 = vadd.f32 %v1465_v32, %v1420_v20 }
 0x155   : > { %v1602_v25 = vadd.f32 %v1585_v34, %v1541_v59 }
 0x156   : > { %v1542_v30 = vadd.f32 %v1526_v53, %v1481_v18 }
 0x157   : > { %1610 = vst [vmem:[%s3075_s25 + $0x30] sm:$0xff] %v1602_v25 }
 0x158   : > { %v1603_v52 = vadd.f32 %v1587_v29, %v1542_v30 }
 0x15a   : > { %1611 = vst [vmem:[%s3075_s25 + $0x38] sm:$0xff] %v1603_v52 }
 0x15b   : > { %1827 = shalt.err (!%p1824_p2)
}
 0x15c   : > { %s1828_s7 = scalar_lea.hbm %s3199_s30, 1024  ;;  %s1832_s16 = scalar_lea.hbm %s3250_s2, 2048 }
 0x15d   : > { %p1829_p3 = scmp.ne.s32.totalorder %s3199_s30, %s1828_s7  ;;  %p1833_p8 = scmp.lt.u32.totalorder %s3199_s30, %s3250_s2 }
 0x15e   : > { %p1834_p11 = scmp.lt.u32.totalorder %s1832_s16, %s1828_s7  ;;  %p1836_p10 = scmp.lt.u32.totalorder %s1828_s7, %s3199_s30 }
 0x15f   : > { %p1830_p4 = pnand %p1829_p3, %p1943_p5 }
 0x160   : > { %p1835_p9 = por %p1834_p11, %p1833_p8 }
 0x161   : > { %p1831_p7 = pneg %p1830_p4 }
 0x162   : > { %p1837_p12 = por %p1836_p10, %p1835_p9 }
 0x164   : > { %p1838_p13 = pnand %p1837_p12, %p1831_p7 }
 0x166   : > { %1841 = shalt.err (!%p1838_p13)
}
 0x167   : > { %s1888_s22 = smov 128   ;;  %s1889_s23 = smov 8  }
 0x168   : > { %1747 = dma.vmem_to_hbm [thread:$0]  (%p1943_p5), %s3201_s27, 1024, %s3199_s30, %s3207_s13, %s1888_s22, %s1888_s22, %s1889_s23  }
 0x169 PF: > { %p1759_p0 = scmp.ge.s32.totalorder %s1880_s12, 2  ;;  %s1642_s24 = sand.u32 1, %s1868_s9  }
 0x16a   : > { %s1643_s25 = scalar_lea.sflag [#allocation3], %s1642_s24 }
 0x16b   : > { %p1754_p1 = pnand %p1759_p0, %p1947_p6 }
 0x16d   : > { %1863 = dma.done.wait (!%p1754_p1), %s1643_s25, 1024  }
 0x16e   : > { %1865 = vsyncadd (!%p1754_p1), %s1643_s25, 4294966272  ;;  %p13_p2 = scmp.ge.s32.totalorder %s1930_s15, 4   ;;  %s3280_s9 = smov %s1872_s10 }
 0x16f   : > { %s3281_s10 = smov %s1876_s11  ;;  %s3282_s11 = smov %s1941_s18 }
 0x170   : > { %s3283_s12 = smov %s1930_s15  ;;  %15 = sbr.rel (!%p13_p2) target bundleno = 4 (0x4), region = 68 }
 0x177   :  { %1648 = vsyncpa [#allocation3], 1 }
 0x178   :  { %1650 = vsyncpa [#allocation3 + $0x1], 1 }
 0x179   :  { %1651 = vsyncpa [#allocation4], 1 }
 0x17a   :  { %1653 = vsyncpa [#allocation4 + $0x1], 1 }

</bundles_post_ra>
